<compile_context>
chip_gen: v6e
topology: v6e:2x2x1
jax: 0.10.0
libtpu: 0.0.40
codegen_flags: <defaults>
</compile_context>

<pallas_src>
import jax
import jax.numpy as jnp
from jax import lax
from jax.experimental import pallas as pl
from jax.experimental.pallas import tpu as pltpu
import numpy as np


# ----------------------------- config ---------------------------------------
class Config:
    n_mels = 8
    dim = 32
    upsample = [2, 2]
    k_u = [4, 4]
    k_r = [3, 3]
    D_r = [[1, 3], [1, 3]]


def compute_pad(k, d):
    return d * (k - 1) // 2


# ----------------------------- in-kernel helpers ------------------------------
def _leaky(x):
    return jnp.maximum(x, 0.1 * x)


def _conv(x, w, K, dil, pad):
    """x: (Cin, T) value (channels on sublanes, time on lanes).
    w: (Cout_padded, K*Cin+1) value, bias folded into the last column.
    One MXU matmul per conv; the K tap slices are stacked along SUBLANES at
    8-aligned offsets (Cin in {8,16,32}), so no lane-offset merges."""
    Cin, T = x.shape
    T_out = T + 2 * pad - (K - 1) * dil
    if pad > 0:
        z = jnp.zeros((Cin, pad), jnp.float32)
        xp = jnp.concatenate([z, x, z], axis=1)
    else:
        xp = x
    taps = [xp[:, k * dil:k * dil + T_out] for k in range(K)]
    taps.append(jnp.ones((1, T_out), jnp.float32))          # bias row
    patches = jnp.concatenate(taps, axis=0)                  # (K*Cin+1, T_out)
    return jnp.dot(w, patches, preferred_element_type=jnp.float32)


def _zero_insert(x, stride, scr):
    """Exact zero-insertion along time (lanes) using a zeroed VMEM scratch and
    T single-column stores — O(T) work, no O(T^2) selection matmul."""
    if stride == 1:
        return x
    C, T = x.shape
    T_up = (T - 1) * stride + 1
    scr[0:C, 0:T_up] = jnp.zeros((C, T_up), jnp.float32)
    for u in range(T):
        scr[0:C, u * stride:u * stride + 1] = x[:, u:u + 1]
    return scr[0:C, 0:T_up]


def _layer_conv(x, w_ref, meta):
    """Slice this layer's packed weight block out of the slab and run the conv.
    Blocks are stored row-padded to multiples of 8 with zeros, so we always do
    an 8-aligned sublane read and drop the extra (all-zero) output rows."""
    w = w_ref[meta["r0"]:meta["r0"] + meta["rows"], 0:meta["width"]]
    y = _conv(x, w, meta["K"], meta["dil"], meta["pad"])
    if meta["rows"] != meta["cout"]:
        y = y[0:meta["cout"], :]
    return y


# ----------------------------- fused kernel ----------------------------------
def _make_generator_kernel(metas):
    def kernel(x_ref, w_ref, o_ref, scr):
        x = x_ref[0].astype(jnp.float32)          # (Cin, T) straight from NCT
        xr = None
        acc = None
        for meta in metas:
            kind = meta["kind"]
            if kind == "pre":
                x = _layer_conv(x, w_ref, meta)
            elif kind == "up":
                # leaky -> ConvTranspose1d (zero-insert + flipped cross-corr)
                h = _zero_insert(_leaky(x), meta["stride"], scr)
                x = _layer_conv(h, w_ref, meta)
            elif kind == "res":
                if meta["first"]:
                    xr = x                         # residual stays in vregs
                xr = xr + _layer_conv(_leaky(xr), w_ref, meta)
                if meta["last"]:
                    acc = xr if meta["m"] == 0 else acc + xr
                    if meta["m"] == meta["M"] - 1:
                        x = acc * (1.0 / meta["M"])
            else:  # "post": leaky -> conv -> tanh -> lane-dense store
                y = jnp.tanh(_layer_conv(_leaky(x), w_ref, meta))
                o_ref[0] = y.astype(o_ref.dtype)   # (1, T_out), lane-dense
    return kernel


# ----------------------------- weight packing ---------------------------------
def _pack_weights(params, cfg):
    """Pack every conv's weight as (Cout, K*Cin+1) [bias in last column], pad to
    8 rows / common lane width, and stack everything into ONE 2-D slab."""
    mats, metas_raw = [], []

    def pack_mat(w_oik, b):
        cout, cin, k = w_oik.shape
        wm = jnp.transpose(w_oik, (0, 2, 1)).reshape(cout, k * cin)
        return jnp.concatenate([wm, b.reshape(cout, 1)], axis=1).astype(jnp.float32)

    def add(kind, w_oik, b, dil, pad, **extra):
        mats.append(pack_mat(w_oik, b))
        metas_raw.append(dict(kind=kind, K=w_oik.shape[-1], dil=dil, pad=pad, **extra))

    K = params["pre_w"].shape[-1]
    add("pre", params["pre_w"], params["pre_b"], 1, (K - 1) // 2)

    M = len(cfg.k_r)
    for l in range(len(cfg.k_u)):
        K, s = cfg.k_u[l], cfg.upsample[l]
        p = (K - s) // 2
        # ConvTranspose1d (Cin, Cout, K) -> equivalent flipped Conv1d weight
        w_eq = jnp.flip(jnp.transpose(params["up"][l]["w"], (1, 0, 2)), axis=-1)
        add("up", w_eq, params["up"][l]["b"], 1, K - 1 - p, stride=s)
        for m in range(M):
            convs = params["res"][l * M + m]
            for j, c in enumerate(convs):
                k = c["w"].shape[-1]
                d = c["dilation"]
                add("res", c["w"], c["b"], d, compute_pad(k, d),
                    first=(j == 0), last=(j == len(convs) - 1), m=m, M=M)

    K = params["post_w"].shape[-1]
    add("post", params["post_w"], params["post_b"], 1, (K - 1) // 2)

    lanes = -(-max(wm.shape[1] for wm in mats) // 128) * 128
    blocks, metas, row = [], [], 0
    for wm, meta in zip(mats, metas_raw):
        cout, width = wm.shape
        rpad = (-cout) % 8
        blocks.append(jnp.pad(wm, ((0, rpad), (0, lanes - width))))
        metas.append(dict(meta, r0=row, cout=cout, rows=cout + rpad, width=width))
        row += cout + rpad
    slab = jnp.concatenate(blocks, axis=0)          # (rows_total, lanes)
    return metas, slab


def _scratch_shape(cfg, T_in):
    """Size the zero-insert scratch: max (Cin, (T-1)*s+1) over upsample levels."""
    T = T_in
    c_max, t_max = 8, 8
    for l in range(len(cfg.k_u)):
        cin = cfg.dim // 2 ** l
        K, s = cfg.k_u[l], cfg.upsample[l]
        p = (K - s) // 2
        c_max = max(c_max, cin)
        t_max = max(t_max, (T - 1) * s + 1)
        T = (T - 1) * s - 2 * p + K
    return (-(-c_max // 8) * 8, -(-t_max // 128) * 128)


# ----------------------------- parameters ------------------------------------
def init_params(key, cfg):
    """Deterministic synthetic weights, PyTorch layouts:
       Conv1d weight (Cout, Cin, K); ConvTranspose1d weight (Cin, Cout, K)."""
    keys = iter(jax.random.split(key, 128))

    def nrm(shape):
        return jax.random.normal(next(keys), shape, jnp.float32) * 0.01

    p = {}
    p["pre_w"] = nrm((cfg.dim, cfg.n_mels, 7))
    p["pre_b"] = nrm((cfg.dim,))
    p["up"] = []
    p["res"] = []
    cout = cfg.dim
    for l in range(len(cfg.k_u)):
        cin = cfg.dim // 2 ** l
        cout = cin // 2
        p["up"].append({"w": nrm((cin, cout, cfg.k_u[l])), "b": nrm((cout,))})
        for m in range(len(cfg.k_r)):
            convs = []
            for d in cfg.D_r[m]:
                convs.append({"w": nrm((cout, cout, cfg.k_r[m])),
                              "b": nrm((cout,)),
                              "dilation": d})
            p["res"].append(convs)
    p["post_w"] = nrm((1, cout, 7))
    p["post_b"] = nrm((1,))
    return p


# ----------------------------- Pallas forward --------------------------------
def generator_forward_pallas(x_nct, params, cfg):
    metas, slab = _pack_weights(params, cfg)

    B, C_in, T_in = x_nct.shape
    T_out = T_in
    for l in range(len(cfg.k_u)):
        K, s = cfg.k_u[l], cfg.upsample[l]
        p = (K - s) // 2
        T_out = (T_out - 1) * s - 2 * p + K
    scr_shape = _scratch_shape(cfg, T_in)

    out = pl.pallas_call(
        _make_generator_kernel(metas),
        out_shape=jax.ShapeDtypeStruct((B, 1, T_out), jnp.float32),
        grid=(B,),
        in_specs=[
            pl.BlockSpec((1, C_in, T_in), lambda b: (b, 0, 0)),   # NCT, as-is
            pl.BlockSpec(slab.shape, lambda b: (0, 0)),           # one weight slab
        ],
        out_specs=pl.BlockSpec((1, 1, T_out), lambda b: (b, 0, 0)),
        scratch_shapes=[pltpu.VMEM(scr_shape, jnp.float32)],
        compiler_params=pltpu.CompilerParams(dimension_semantics=("parallel",)),
    )(x_nct.astype(jnp.float32), slab)
    return out                                                     # (B, 1, T_out)


# ----------------------------- pure-JAX reference -----------------------------
def _conv1d_ref(x, w, b, pad, dilation=1, lhs_dilation=1):
    out = lax.conv_general_dilated(
        x, w, window_strides=(1,), padding=[(pad, pad)],
        lhs_dilation=(lhs_dilation,), rhs_dilation=(dilation,),
        dimension_numbers=("NCH", "OIH", "NCH"))
    return out + b[None, :, None]


def generator_forward_ref(x, params, cfg):
    x = _conv1d_ref(x, params["pre_w"], params["pre_b"], 3)
    M = len(cfg.k_r)
    for l in range(len(cfg.k_u)):
        x = jax.nn.leaky_relu(x, 0.1)
        up = params["up"][l]
        K = cfg.k_u[l]
        s = cfg.upsample[l]
        p = (K - s) // 2
        w_eq = jnp.flip(jnp.transpose(up["w"], (1, 0, 2)), axis=-1)
        x = _conv1d_ref(x, w_eq, up["b"], K - 1 - p, lhs_dilation=s)
        acc = None
        for m in range(M):
            xr = x
            for c in params["res"][l * M + m]:
                d = c["dilation"]
                k = c["w"].shape[-1]
                xr = xr + _conv1d_ref(jax.nn.leaky_relu(xr, 0.1), c["w"], c["b"],
                                      compute_pad(k, d), dilation=d)
            acc = xr if acc is None else acc + xr
        x = acc / M
    x = jax.nn.leaky_relu(x, 0.1)
    x = _conv1d_ref(x, params["post_w"], params["post_b"], 3)
    return jnp.tanh(x)


# ----------------------------- main ------------------------------------------
if __name__ == "__main__":
    cfg = Config()
    key = jax.random.PRNGKey(0)
    kp, kx = jax.random.split(key)
    params = init_params(kp, cfg)

    B, T_in = 2, 16
    x = jax.random.normal(kx, (B, cfg.n_mels, T_in), jnp.float32)  # NCT (PyTorch)

    y = generator_forward_pallas(x, params, cfg)
    y = jax.block_until_ready(y)

    total_up = int(np.prod(cfg.upsample))
    assert y.shape == (B, 1, T_in * total_up), y.shape

    y_ref = generator_forward_ref(x, params, cfg)
    np.testing.assert_allclose(np.asarray(y), np.asarray(y_ref),
                               rtol=1e-4, atol=1e-5)

    print("KERNEL_OK")
</pallas_src>

<mosaic_0001>
module attributes {stable_mosaic.version = 11 : i64} {
  func.func @kernel(%arg0: i32, %arg1: memref<1x8x16xf32, #tpu.memory_space<vmem>>, %arg2: memref<160x256xf32, #tpu.memory_space<vmem>>, %arg3: memref<1x1x64xf32, #tpu.memory_space<vmem>>, %arg4: memref<32x128xf32, #tpu.memory_space<vmem>>) attributes {dimension_semantics = [#tpu.dimension_semantics<parallel>], iteration_bounds = array<i64: 2>, scalar_prefetch = 0 : i64, scratch_operands = 1 : i64, tpu.core_type = #tpu.core_type<tc>, window_params = [{transform_indices = @transform_0, window_bounds = array<i64: 1, 8, 16>}, {pipeline_mode = #tpu.pipeline_mode<synchronous>, transform_indices = @transform_1, window_bounds = array<i64: 160, 256>}, {transform_indices = @transform_2, window_bounds = array<i64: 1, 1, 64>}]} {
    %c0 = arith.constant 0 : index
    %c0_0 = arith.constant 0 : index
    %c0_1 = arith.constant 0 : index
    %0 = vector.load %arg1[%c0, %c0_0, %c0_1] : memref<1x8x16xf32, #tpu.memory_space<vmem>>, vector<1x8x16xf32>
    %1 = vector.shape_cast %0 : vector<1x8x16xf32> to vector<8x16xf32>
    %c0_2 = arith.constant 0 : index
    %c0_3 = arith.constant 0 : index
    %2 = vector.load %arg2[%c0_2, %c0_3] : memref<160x256xf32, #tpu.memory_space<vmem>>, vector<32x57xf32>
    %cst = arith.constant 0.000000e+00 : f32
    %3 = vector.broadcast %cst : f32 to vector<8x3xf32>
    %4 = tpu.concatenate %3, %1, %3 in 1 : vector<8x3xf32>, vector<8x16xf32>, vector<8x3xf32> -> vector<8x22xf32>
    %5 = vector.extract_strided_slice %4 {offsets = [0, 0], sizes = [8, 16], strides = [1, 1]} : vector<8x22xf32> to vector<8x16xf32>
    %6 = vector.extract_strided_slice %4 {offsets = [0, 1], sizes = [8, 16], strides = [1, 1]} : vector<8x22xf32> to vector<8x16xf32>
    %7 = vector.extract_strided_slice %4 {offsets = [0, 2], sizes = [8, 16], strides = [1, 1]} : vector<8x22xf32> to vector<8x16xf32>
    %8 = vector.extract_strided_slice %4 {offsets = [0, 3], sizes = [8, 16], strides = [1, 1]} : vector<8x22xf32> to vector<8x16xf32>
    %9 = vector.extract_strided_slice %4 {offsets = [0, 4], sizes = [8, 16], strides = [1, 1]} : vector<8x22xf32> to vector<8x16xf32>
    %10 = vector.extract_strided_slice %4 {offsets = [0, 5], sizes = [8, 16], strides = [1, 1]} : vector<8x22xf32> to vector<8x16xf32>
    %11 = vector.extract_strided_slice %4 {offsets = [0, 6], sizes = [8, 16], strides = [1, 1]} : vector<8x22xf32> to vector<8x16xf32>
    %cst_4 = arith.constant 1.000000e+00 : f32
    %12 = vector.broadcast %cst_4 : f32 to vector<1x16xf32>
    %13 = tpu.concatenate %5, %6, %7, %8, %9, %10, %11, %12 in 0 : vector<8x16xf32>, vector<8x16xf32>, vector<8x16xf32>, vector<8x16xf32>, vector<8x16xf32>, vector<8x16xf32>, vector<8x16xf32>, vector<1x16xf32> -> vector<57x16xf32>
    %cst_5 = arith.constant dense<0.000000e+00> : vector<32x16xf32>
    %14 = tpu.matmul %2, %13, %cst_5 {dimension_numbers = #tpu.dot_dimension_numbers<[1], [0], [0], [1], [0, 0, 1, 1], [], []>} : vector<32x57xf32>, vector<57x16xf32>, vector<32x16xf32> -> vector<32x16xf32>
    %cst_6 = arith.constant 1.000000e-01 : f32
    %15 = vector.broadcast %cst_6 : f32 to vector<32x16xf32>
    %16 = arith.mulf %15, %14 : vector<32x16xf32>
    %17 = arith.maximumf %14, %16 : vector<32x16xf32>
    %cst_7 = arith.constant 0.000000e+00 : f32
    %18 = vector.broadcast %cst_7 : f32 to vector<32x31xf32>
    %c0_8 = arith.constant 0 : index
    %c0_9 = arith.constant 0 : index
    %19 = vector.load %arg4[%c0_8, %c0_9] : memref<32x128xf32, #tpu.memory_space<vmem>>, vector<32x31xf32>
    tpu.vector_store %arg4[%c0_8, %c0_9], %18 {strides = array<i32>} : memref<32x128xf32, #tpu.memory_space<vmem>>, vector<32x31xf32>,
    %20 = vector.extract_strided_slice %17 {offsets = [0, 0], sizes = [32, 1], strides = [1, 1]} : vector<32x16xf32> to vector<32x1xf32>
    %c0_10 = arith.constant 0 : index
    %c0_11 = arith.constant 0 : index
    %21 = vector.load %arg4[%c0_10, %c0_11] : memref<32x128xf32, #tpu.memory_space<vmem>>, vector<32x1xf32>
    tpu.vector_store %arg4[%c0_10, %c0_11], %20 {strides = array<i32>} : memref<32x128xf32, #tpu.memory_space<vmem>>, vector<32x1xf32>,
    %22 = vector.extract_strided_slice %17 {offsets = [0, 1], sizes = [32, 1], strides = [1, 1]} : vector<32x16xf32> to vector<32x1xf32>
    %c0_12 = arith.constant 0 : index
    %c2 = arith.constant 2 : index
    %23 = vector.load %arg4[%c0_12, %c2] : memref<32x128xf32, #tpu.memory_space<vmem>>, vector<32x1xf32>
    tpu.vector_store %arg4[%c0_12, %c2], %22 {strides = array<i32>} : memref<32x128xf32, #tpu.memory_space<vmem>>, vector<32x1xf32>,
    %24 = vector.extract_strided_slice %17 {offsets = [0, 2], sizes = [32, 1], strides = [1, 1]} : vector<32x16xf32> to vector<32x1xf32>
    %c0_13 = arith.constant 0 : index
    %c4 = arith.constant 4 : index
    %25 = vector.load %arg4[%c0_13, %c4] : memref<32x128xf32, #tpu.memory_space<vmem>>, vector<32x1xf32>
    tpu.vector_store %arg4[%c0_13, %c4], %24 {strides = array<i32>} : memref<32x128xf32, #tpu.memory_space<vmem>>, vector<32x1xf32>,
    %26 = vector.extract_strided_slice %17 {offsets = [0, 3], sizes = [32, 1], strides = [1, 1]} : vector<32x16xf32> to vector<32x1xf32>
    %c0_14 = arith.constant 0 : index
    %c6 = arith.constant 6 : index
    %27 = vector.load %arg4[%c0_14, %c6] : memref<32x128xf32, #tpu.memory_space<vmem>>, vector<32x1xf32>
    tpu.vector_store %arg4[%c0_14, %c6], %26 {strides = array<i32>} : memref<32x128xf32, #tpu.memory_space<vmem>>, vector<32x1xf32>,
    %28 = vector.extract_strided_slice %17 {offsets = [0, 4], sizes = [32, 1], strides = [1, 1]} : vector<32x16xf32> to vector<32x1xf32>
    %c0_15 = arith.constant 0 : index
    %c8 = arith.constant 8 : index
    %29 = vector.load %arg4[%c0_15, %c8] : memref<32x128xf32, #tpu.memory_space<vmem>>, vector<32x1xf32>
    tpu.vector_store %arg4[%c0_15, %c8], %28 {strides = array<i32>} : memref<32x128xf32, #tpu.memory_space<vmem>>, vector<32x1xf32>,
    %30 = vector.extract_strided_slice %17 {offsets = [0, 5], sizes = [32, 1], strides = [1, 1]} : vector<32x16xf32> to vector<32x1xf32>
    %c0_16 = arith.constant 0 : index
    %c10 = arith.constant 10 : index
    %31 = vector.load %arg4[%c0_16, %c10] : memref<32x128xf32, #tpu.memory_space<vmem>>, vector<32x1xf32>
    tpu.vector_store %arg4[%c0_16, %c10], %30 {strides = array<i32>} : memref<32x128xf32, #tpu.memory_space<vmem>>, vector<32x1xf32>,
    %32 = vector.extract_strided_slice %17 {offsets = [0, 6], sizes = [32, 1], strides = [1, 1]} : vector<32x16xf32> to vector<32x1xf32>
    %c0_17 = arith.constant 0 : index
    %c12 = arith.constant 12 : index
    %33 = vector.load %arg4[%c0_17, %c12] : memref<32x128xf32, #tpu.memory_space<vmem>>, vector<32x1xf32>
    tpu.vector_store %arg4[%c0_17, %c12], %32 {strides = array<i32>} : memref<32x128xf32, #tpu.memory_space<vmem>>, vector<32x1xf32>,
    %34 = vector.extract_strided_slice %17 {offsets = [0, 7], sizes = [32, 1], strides = [1, 1]} : vector<32x16xf32> to vector<32x1xf32>
    %c0_18 = arith.constant 0 : index
    %c14 = arith.constant 14 : index
    %35 = vector.load %arg4[%c0_18, %c14] : memref<32x128xf32, #tpu.memory_space<vmem>>, vector<32x1xf32>
    tpu.vector_store %arg4[%c0_18, %c14], %34 {strides = array<i32>} : memref<32x128xf32, #tpu.memory_space<vmem>>, vector<32x1xf32>,
    %36 = vector.extract_strided_slice %17 {offsets = [0, 8], sizes = [32, 1], strides = [1, 1]} : vector<32x16xf32> to vector<32x1xf32>
    %c0_19 = arith.constant 0 : index
    %c16 = arith.constant 16 : index
    %37 = vector.load %arg4[%c0_19, %c16] : memref<32x128xf32, #tpu.memory_space<vmem>>, vector<32x1xf32>
    tpu.vector_store %arg4[%c0_19, %c16], %36 {strides = array<i32>} : memref<32x128xf32, #tpu.memory_space<vmem>>, vector<32x1xf32>,
    %38 = vector.extract_strided_slice %17 {offsets = [0, 9], sizes = [32, 1], strides = [1, 1]} : vector<32x16xf32> to vector<32x1xf32>
    %c0_20 = arith.constant 0 : index
    %c18 = arith.constant 18 : index
    %39 = vector.load %arg4[%c0_20, %c18] : memref<32x128xf32, #tpu.memory_space<vmem>>, vector<32x1xf32>
    tpu.vector_store %arg4[%c0_20, %c18], %38 {strides = array<i32>} : memref<32x128xf32, #tpu.memory_space<vmem>>, vector<32x1xf32>,
    %40 = vector.extract_strided_slice %17 {offsets = [0, 10], sizes = [32, 1], strides = [1, 1]} : vector<32x16xf32> to vector<32x1xf32>
    %c0_21 = arith.constant 0 : index
    %c20 = arith.constant 20 : index
    %41 = vector.load %arg4[%c0_21, %c20] : memref<32x128xf32, #tpu.memory_space<vmem>>, vector<32x1xf32>
    tpu.vector_store %arg4[%c0_21, %c20], %40 {strides = array<i32>} : memref<32x128xf32, #tpu.memory_space<vmem>>, vector<32x1xf32>,
    %42 = vector.extract_strided_slice %17 {offsets = [0, 11], sizes = [32, 1], strides = [1, 1]} : vector<32x16xf32> to vector<32x1xf32>
    %c0_22 = arith.constant 0 : index
    %c22 = arith.constant 22 : index
    %43 = vector.load %arg4[%c0_22, %c22] : memref<32x128xf32, #tpu.memory_space<vmem>>, vector<32x1xf32>
    tpu.vector_store %arg4[%c0_22, %c22], %42 {strides = array<i32>} : memref<32x128xf32, #tpu.memory_space<vmem>>, vector<32x1xf32>,
    %44 = vector.extract_strided_slice %17 {offsets = [0, 12], sizes = [32, 1], strides = [1, 1]} : vector<32x16xf32> to vector<32x1xf32>
    %c0_23 = arith.constant 0 : index
    %c24 = arith.constant 24 : index
    %45 = vector.load %arg4[%c0_23, %c24] : memref<32x128xf32, #tpu.memory_space<vmem>>, vector<32x1xf32>
    tpu.vector_store %arg4[%c0_23, %c24], %44 {strides = array<i32>} : memref<32x128xf32, #tpu.memory_space<vmem>>, vector<32x1xf32>,
    %46 = vector.extract_strided_slice %17 {offsets = [0, 13], sizes = [32, 1], strides = [1, 1]} : vector<32x16xf32> to vector<32x1xf32>
    %c0_24 = arith.constant 0 : index
    %c26 = arith.constant 26 : index
    %47 = vector.load %arg4[%c0_24, %c26] : memref<32x128xf32, #tpu.memory_space<vmem>>, vector<32x1xf32>
    tpu.vector_store %arg4[%c0_24, %c26], %46 {strides = array<i32>} : memref<32x128xf32, #tpu.memory_space<vmem>>, vector<32x1xf32>,
    %48 = vector.extract_strided_slice %17 {offsets = [0, 14], sizes = [32, 1], strides = [1, 1]} : vector<32x16xf32> to vector<32x1xf32>
    %c0_25 = arith.constant 0 : index
    %c28 = arith.constant 28 : index
    %49 = vector.load %arg4[%c0_25, %c28] : memref<32x128xf32, #tpu.memory_space<vmem>>, vector<32x1xf32>
    tpu.vector_store %arg4[%c0_25, %c28], %48 {strides = array<i32>} : memref<32x128xf32, #tpu.memory_space<vmem>>, vector<32x1xf32>,
    %50 = vector.extract_strided_slice %17 {offsets = [0, 15], sizes = [32, 1], strides = [1, 1]} : vector<32x16xf32> to vector<32x1xf32>
    %c0_26 = arith.constant 0 : index
    %c30 = arith.constant 30 : index
    %51 = vector.load %arg4[%c0_26, %c30] : memref<32x128xf32, #tpu.memory_space<vmem>>, vector<32x1xf32>
    tpu.vector_store %arg4[%c0_26, %c30], %50 {strides = array<i32>} : memref<32x128xf32, #tpu.memory_space<vmem>>, vector<32x1xf32>,
    %c0_27 = arith.constant 0 : index
    %c0_28 = arith.constant 0 : index
    %52 = vector.load %arg4[%c0_27, %c0_28] : memref<32x128xf32, #tpu.memory_space<vmem>>, vector<32x31xf32>
    %c32 = arith.constant 32 : index
    %c0_29 = arith.constant 0 : index
    %53 = vector.load %arg2[%c32, %c0_29] : memref<160x256xf32, #tpu.memory_space<vmem>>, vector<16x129xf32>
    %cst_30 = arith.constant 0.000000e+00 : f32
    %54 = vector.broadcast %cst_30 : f32 to vector<32x2xf32>
    %55 = tpu.concatenate %54, %52, %54 in 1 : vector<32x2xf32>, vector<32x31xf32>, vector<32x2xf32> -> vector<32x35xf32>
    %56 = vector.extract_strided_slice %55 {offsets = [0, 0], sizes = [32, 32], strides = [1, 1]} : vector<32x35xf32> to vector<32x32xf32>
    %57 = vector.extract_strided_slice %55 {offsets = [0, 1], sizes = [32, 32], strides = [1, 1]} : vector<32x35xf32> to vector<32x32xf32>
    %58 = vector.extract_strided_slice %55 {offsets = [0, 2], sizes = [32, 32], strides = [1, 1]} : vector<32x35xf32> to vector<32x32xf32>
    %59 = vector.extract_strided_slice %55 {offsets = [0, 3], sizes = [32, 32], strides = [1, 1]} : vector<32x35xf32> to vector<32x32xf32>
    %cst_31 = arith.constant 1.000000e+00 : f32
    %60 = vector.broadcast %cst_31 : f32 to vector<1x32xf32>
    %61 = tpu.concatenate %56, %57, %58, %59, %60 in 0 : vector<32x32xf32>, vector<32x32xf32>, vector<32x32xf32>, vector<32x32xf32>, vector<1x32xf32> -> vector<129x32xf32>
    %cst_32 = arith.constant dense<0.000000e+00> : vector<16x32xf32>
    %62 = tpu.matmul %53, %61, %cst_32 {dimension_numbers = #tpu.dot_dimension_numbers<[1], [0], [0], [1], [0, 0, 1, 1], [], []>} : vector<16x129xf32>, vector<129x32xf32>, vector<16x32xf32> -> vector<16x32xf32>
    %cst_33 = arith.constant 1.000000e-01 : f32
    %63 = vector.broadcast %cst_33 : f32 to vector<16x32xf32>
    %64 = arith.mulf %63, %62 : vector<16x32xf32>
    %65 = arith.maximumf %62, %64 : vector<16x32xf32>
    %c48 = arith.constant 48 : index
    %c0_34 = arith.constant 0 : index
    %66 = vector.load %arg2[%c48, %c0_34] : memref<160x256xf32, #tpu.memory_space<vmem>>, vector<16x49xf32>
    %cst_35 = arith.constant 0.000000e+00 : f32
    %67 = vector.broadcast %cst_35 : f32 to vector<16x1xf32>
    %68 = tpu.concatenate %67, %65, %67 in 1 : vector<16x1xf32>, vector<16x32xf32>, vector<16x1xf32> -> vector<16x34xf32>
    %69 = vector.extract_strided_slice %68 {offsets = [0, 0], sizes = [16, 32], strides = [1, 1]} : vector<16x34xf32> to vector<16x32xf32>
    %70 = vector.extract_strided_slice %68 {offsets = [0, 1], sizes = [16, 32], strides = [1, 1]} : vector<16x34xf32> to vector<16x32xf32>
    %71 = vector.extract_strided_slice %68 {offsets = [0, 2], sizes = [16, 32], strides = [1, 1]} : vector<16x34xf32> to vector<16x32xf32>
    %cst_36 = arith.constant 1.000000e+00 : f32
    %72 = vector.broadcast %cst_36 : f32 to vector<1x32xf32>
    %73 = tpu.concatenate %69, %70, %71, %72 in 0 : vector<16x32xf32>, vector<16x32xf32>, vector<16x32xf32>, vector<1x32xf32> -> vector<49x32xf32>
    %cst_37 = arith.constant dense<0.000000e+00> : vector<16x32xf32>
    %74 = tpu.matmul %66, %73, %cst_37 {dimension_numbers = #tpu.dot_dimension_numbers<[1], [0], [0], [1], [0, 0, 1, 1], [], []>} : vector<16x49xf32>, vector<49x32xf32>, vector<16x32xf32> -> vector<16x32xf32>
    %75 = arith.addf %62, %74 : vector<16x32xf32>
    %cst_38 = arith.constant 1.000000e-01 : f32
    %76 = vector.broadcast %cst_38 : f32 to vector<16x32xf32>
    %77 = arith.mulf %76, %75 : vector<16x32xf32>
    %78 = arith.maximumf %75, %77 : vector<16x32xf32>
    %c64 = arith.constant 64 : index
    %c0_39 = arith.constant 0 : index
    %79 = vector.load %arg2[%c64, %c0_39] : memref<160x256xf32, #tpu.memory_space<vmem>>, vector<16x49xf32>
    %cst_40 = arith.constant 0.000000e+00 : f32
    %80 = vector.broadcast %cst_40 : f32 to vector<16x3xf32>
    %81 = tpu.concatenate %80, %78, %80 in 1 : vector<16x3xf32>, vector<16x32xf32>, vector<16x3xf32> -> vector<16x38xf32>
    %82 = vector.extract_strided_slice %81 {offsets = [0, 0], sizes = [16, 32], strides = [1, 1]} : vector<16x38xf32> to vector<16x32xf32>
    %83 = vector.extract_strided_slice %81 {offsets = [0, 3], sizes = [16, 32], strides = [1, 1]} : vector<16x38xf32> to vector<16x32xf32>
    %84 = vector.extract_strided_slice %81 {offsets = [0, 6], sizes = [16, 32], strides = [1, 1]} : vector<16x38xf32> to vector<16x32xf32>
    %cst_41 = arith.constant 1.000000e+00 : f32
    %85 = vector.broadcast %cst_41 : f32 to vector<1x32xf32>
    %86 = tpu.concatenate %82, %83, %84, %85 in 0 : vector<16x32xf32>, vector<16x32xf32>, vector<16x32xf32>, vector<1x32xf32> -> vector<49x32xf32>
    %cst_42 = arith.constant dense<0.000000e+00> : vector<16x32xf32>
    %87 = tpu.matmul %79, %86, %cst_42 {dimension_numbers = #tpu.dot_dimension_numbers<[1], [0], [0], [1], [0, 0, 1, 1], [], []>} : vector<16x49xf32>, vector<49x32xf32>, vector<16x32xf32> -> vector<16x32xf32>
    %88 = arith.addf %75, %87 : vector<16x32xf32>
    %cst_43 = arith.constant 1.000000e-01 : f32
    %89 = vector.broadcast %cst_43 : f32 to vector<16x32xf32>
    %90 = arith.mulf %89, %62 : vector<16x32xf32>
    %91 = arith.maximumf %62, %90 : vector<16x32xf32>
    %c80 = arith.constant 80 : index
    %c0_44 = arith.constant 0 : index
    %92 = vector.load %arg2[%c80, %c0_44] : memref<160x256xf32, #tpu.memory_space<vmem>>, vector<16x49xf32>
    %cst_45 = arith.constant 0.000000e+00 : f32
    %93 = vector.broadcast %cst_45 : f32 to vector<16x1xf32>
    %94 = tpu.concatenate %93, %91, %93 in 1 : vector<16x1xf32>, vector<16x32xf32>, vector<16x1xf32> -> vector<16x34xf32>
    %95 = vector.extract_strided_slice %94 {offsets = [0, 0], sizes = [16, 32], strides = [1, 1]} : vector<16x34xf32> to vector<16x32xf32>
    %96 = vector.extract_strided_slice %94 {offsets = [0, 1], sizes = [16, 32], strides = [1, 1]} : vector<16x34xf32> to vector<16x32xf32>
    %97 = vector.extract_strided_slice %94 {offsets = [0, 2], sizes = [16, 32], strides = [1, 1]} : vector<16x34xf32> to vector<16x32xf32>
    %cst_46 = arith.constant 1.000000e+00 : f32
    %98 = vector.broadcast %cst_46 : f32 to vector<1x32xf32>
    %99 = tpu.concatenate %95, %96, %97, %98 in 0 : vector<16x32xf32>, vector<16x32xf32>, vector<16x32xf32>, vector<1x32xf32> -> vector<49x32xf32>
    %cst_47 = arith.constant dense<0.000000e+00> : vector<16x32xf32>
    %100 = tpu.matmul %92, %99, %cst_47 {dimension_numbers = #tpu.dot_dimension_numbers<[1], [0], [0], [1], [0, 0, 1, 1], [], []>} : vector<16x49xf32>, vector<49x32xf32>, vector<16x32xf32> -> vector<16x32xf32>
    %101 = arith.addf %62, %100 : vector<16x32xf32>
    %cst_48 = arith.constant 1.000000e-01 : f32
    %102 = vector.broadcast %cst_48 : f32 to vector<16x32xf32>
    %103 = arith.mulf %102, %101 : vector<16x32xf32>
    %104 = arith.maximumf %101, %103 : vector<16x32xf32>
    %c96 = arith.constant 96 : index
    %c0_49 = arith.constant 0 : index
    %105 = vector.load %arg2[%c96, %c0_49] : memref<160x256xf32, #tpu.memory_space<vmem>>, vector<16x49xf32>
    %cst_50 = arith.constant 0.000000e+00 : f32
    %106 = vector.broadcast %cst_50 : f32 to vector<16x3xf32>
    %107 = tpu.concatenate %106, %104, %106 in 1 : vector<16x3xf32>, vector<16x32xf32>, vector<16x3xf32> -> vector<16x38xf32>
    %108 = vector.extract_strided_slice %107 {offsets = [0, 0], sizes = [16, 32], strides = [1, 1]} : vector<16x38xf32> to vector<16x32xf32>
    %109 = vector.extract_strided_slice %107 {offsets = [0, 3], sizes = [16, 32], strides = [1, 1]} : vector<16x38xf32> to vector<16x32xf32>
    %110 = vector.extract_strided_slice %107 {offsets = [0, 6], sizes = [16, 32], strides = [1, 1]} : vector<16x38xf32> to vector<16x32xf32>
    %cst_51 = arith.constant 1.000000e+00 : f32
    %111 = vector.broadcast %cst_51 : f32 to vector<1x32xf32>
    %112 = tpu.concatenate %108, %109, %110, %111 in 0 : vector<16x32xf32>, vector<16x32xf32>, vector<16x32xf32>, vector<1x32xf32> -> vector<49x32xf32>
    %cst_52 = arith.constant dense<0.000000e+00> : vector<16x32xf32>
    %113 = tpu.matmul %105, %112, %cst_52 {dimension_numbers = #tpu.dot_dimension_numbers<[1], [0], [0], [1], [0, 0, 1, 1], [], []>} : vector<16x49xf32>, vector<49x32xf32>, vector<16x32xf32> -> vector<16x32xf32>
    %114 = arith.addf %101, %113 : vector<16x32xf32>
    %115 = arith.addf %88, %114 : vector<16x32xf32>
    %cst_53 = arith.constant 5.000000e-01 : f32
    %116 = vector.broadcast %cst_53 : f32 to vector<16x32xf32>
    %117 = arith.mulf %115, %116 : vector<16x32xf32>
    %cst_54 = arith.constant 1.000000e-01 : f32
    %118 = vector.broadcast %cst_54 : f32 to vector<16x32xf32>
    %119 = arith.mulf %118, %117 : vector<16x32xf32>
    %120 = arith.maximumf %117, %119 : vector<16x32xf32>
    %cst_55 = arith.constant 0.000000e+00 : f32
    %121 = vector.broadcast %cst_55 : f32 to vector<16x63xf32>
    %c0_56 = arith.constant 0 : index
    %c0_57 = arith.constant 0 : index
    %122 = vector.load %arg4[%c0_56, %c0_57] : memref<32x128xf32, #tpu.memory_space<vmem>>, vector<16x63xf32>
    tpu.vector_store %arg4[%c0_56, %c0_57], %121 {strides = array<i32>} : memref<32x128xf32, #tpu.memory_space<vmem>>, vector<16x63xf32>,
    %123 = vector.extract_strided_slice %120 {offsets = [0, 0], sizes = [16, 1], strides = [1, 1]} : vector<16x32xf32> to vector<16x1xf32>
    %c0_58 = arith.constant 0 : index
    %c0_59 = arith.constant 0 : index
    %124 = vector.load %arg4[%c0_58, %c0_59] : memref<32x128xf32, #tpu.memory_space<vmem>>, vector<16x1xf32>
    tpu.vector_store %arg4[%c0_58, %c0_59], %123 {strides = array<i32>} : memref<32x128xf32, #tpu.memory_space<vmem>>, vector<16x1xf32>,
    %125 = vector.extract_strided_slice %120 {offsets = [0, 1], sizes = [16, 1], strides = [1, 1]} : vector<16x32xf32> to vector<16x1xf32>
    %c0_60 = arith.constant 0 : index
    %c2_61 = arith.constant 2 : index
    %126 = vector.load %arg4[%c0_60, %c2_61] : memref<32x128xf32, #tpu.memory_space<vmem>>, vector<16x1xf32>
    tpu.vector_store %arg4[%c0_60, %c2_61], %125 {strides = array<i32>} : memref<32x128xf32, #tpu.memory_space<vmem>>, vector<16x1xf32>,
    %127 = vector.extract_strided_slice %120 {offsets = [0, 2], sizes = [16, 1], strides = [1, 1]} : vector<16x32xf32> to vector<16x1xf32>
    %c0_62 = arith.constant 0 : index
    %c4_63 = arith.constant 4 : index
    %128 = vector.load %arg4[%c0_62, %c4_63] : memref<32x128xf32, #tpu.memory_space<vmem>>, vector<16x1xf32>
    tpu.vector_store %arg4[%c0_62, %c4_63], %127 {strides = array<i32>} : memref<32x128xf32, #tpu.memory_space<vmem>>, vector<16x1xf32>,
    %129 = vector.extract_strided_slice %120 {offsets = [0, 3], sizes = [16, 1], strides = [1, 1]} : vector<16x32xf32> to vector<16x1xf32>
    %c0_64 = arith.constant 0 : index
    %c6_65 = arith.constant 6 : index
    %130 = vector.load %arg4[%c0_64, %c6_65] : memref<32x128xf32, #tpu.memory_space<vmem>>, vector<16x1xf32>
    tpu.vector_store %arg4[%c0_64, %c6_65], %129 {strides = array<i32>} : memref<32x128xf32, #tpu.memory_space<vmem>>, vector<16x1xf32>,
    %131 = vector.extract_strided_slice %120 {offsets = [0, 4], sizes = [16, 1], strides = [1, 1]} : vector<16x32xf32> to vector<16x1xf32>
    %c0_66 = arith.constant 0 : index
    %c8_67 = arith.constant 8 : index
    %132 = vector.load %arg4[%c0_66, %c8_67] : memref<32x128xf32, #tpu.memory_space<vmem>>, vector<16x1xf32>
    tpu.vector_store %arg4[%c0_66, %c8_67], %131 {strides = array<i32>} : memref<32x128xf32, #tpu.memory_space<vmem>>, vector<16x1xf32>,
    %133 = vector.extract_strided_slice %120 {offsets = [0, 5], sizes = [16, 1], strides = [1, 1]} : vector<16x32xf32> to vector<16x1xf32>
    %c0_68 = arith.constant 0 : index
    %c10_69 = arith.constant 10 : index
    %134 = vector.load %arg4[%c0_68, %c10_69] : memref<32x128xf32, #tpu.memory_space<vmem>>, vector<16x1xf32>
    tpu.vector_store %arg4[%c0_68, %c10_69], %133 {strides = array<i32>} : memref<32x128xf32, #tpu.memory_space<vmem>>, vector<16x1xf32>,
    %135 = vector.extract_strided_slice %120 {offsets = [0, 6], sizes = [16, 1], strides = [1, 1]} : vector<16x32xf32> to vector<16x1xf32>
    %c0_70 = arith.constant 0 : index
    %c12_71 = arith.constant 12 : index
    %136 = vector.load %arg4[%c0_70, %c12_71] : memref<32x128xf32, #tpu.memory_space<vmem>>, vector<16x1xf32>
    tpu.vector_store %arg4[%c0_70, %c12_71], %135 {strides = array<i32>} : memref<32x128xf32, #tpu.memory_space<vmem>>, vector<16x1xf32>,
    %137 = vector.extract_strided_slice %120 {offsets = [0, 7], sizes = [16, 1], strides = [1, 1]} : vector<16x32xf32> to vector<16x1xf32>
    %c0_72 = arith.constant 0 : index
    %c14_73 = arith.constant 14 : index
    %138 = vector.load %arg4[%c0_72, %c14_73] : memref<32x128xf32, #tpu.memory_space<vmem>>, vector<16x1xf32>
    tpu.vector_store %arg4[%c0_72, %c14_73], %137 {strides = array<i32>} : memref<32x128xf32, #tpu.memory_space<vmem>>, vector<16x1xf32>,
    %139 = vector.extract_strided_slice %120 {offsets = [0, 8], sizes = [16, 1], strides = [1, 1]} : vector<16x32xf32> to vector<16x1xf32>
    %c0_74 = arith.constant 0 : index
    %c16_75 = arith.constant 16 : index
    %140 = vector.load %arg4[%c0_74, %c16_75] : memref<32x128xf32, #tpu.memory_space<vmem>>, vector<16x1xf32>
    tpu.vector_store %arg4[%c0_74, %c16_75], %139 {strides = array<i32>} : memref<32x128xf32, #tpu.memory_space<vmem>>, vector<16x1xf32>,
    %141 = vector.extract_strided_slice %120 {offsets = [0, 9], sizes = [16, 1], strides = [1, 1]} : vector<16x32xf32> to vector<16x1xf32>
    %c0_76 = arith.constant 0 : index
    %c18_77 = arith.constant 18 : index
    %142 = vector.load %arg4[%c0_76, %c18_77] : memref<32x128xf32, #tpu.memory_space<vmem>>, vector<16x1xf32>
    tpu.vector_store %arg4[%c0_76, %c18_77], %141 {strides = array<i32>} : memref<32x128xf32, #tpu.memory_space<vmem>>, vector<16x1xf32>,
    %143 = vector.extract_strided_slice %120 {offsets = [0, 10], sizes = [16, 1], strides = [1, 1]} : vector<16x32xf32> to vector<16x1xf32>
    %c0_78 = arith.constant 0 : index
    %c20_79 = arith.constant 20 : index
    %144 = vector.load %arg4[%c0_78, %c20_79] : memref<32x128xf32, #tpu.memory_space<vmem>>, vector<16x1xf32>
    tpu.vector_store %arg4[%c0_78, %c20_79], %143 {strides = array<i32>} : memref<32x128xf32, #tpu.memory_space<vmem>>, vector<16x1xf32>,
    %145 = vector.extract_strided_slice %120 {offsets = [0, 11], sizes = [16, 1], strides = [1, 1]} : vector<16x32xf32> to vector<16x1xf32>
    %c0_80 = arith.constant 0 : index
    %c22_81 = arith.constant 22 : index
    %146 = vector.load %arg4[%c0_80, %c22_81] : memref<32x128xf32, #tpu.memory_space<vmem>>, vector<16x1xf32>
    tpu.vector_store %arg4[%c0_80, %c22_81], %145 {strides = array<i32>} : memref<32x128xf32, #tpu.memory_space<vmem>>, vector<16x1xf32>,
    %147 = vector.extract_strided_slice %120 {offsets = [0, 12], sizes = [16, 1], strides = [1, 1]} : vector<16x32xf32> to vector<16x1xf32>
    %c0_82 = arith.constant 0 : index
    %c24_83 = arith.constant 24 : index
    %148 = vector.load %arg4[%c0_82, %c24_83] : memref<32x128xf32, #tpu.memory_space<vmem>>, vector<16x1xf32>
    tpu.vector_store %arg4[%c0_82, %c24_83], %147 {strides = array<i32>} : memref<32x128xf32, #tpu.memory_space<vmem>>, vector<16x1xf32>,
    %149 = vector.extract_strided_slice %120 {offsets = [0, 13], sizes = [16, 1], strides = [1, 1]} : vector<16x32xf32> to vector<16x1xf32>
    %c0_84 = arith.constant 0 : index
    %c26_85 = arith.constant 26 : index
    %150 = vector.load %arg4[%c0_84, %c26_85] : memref<32x128xf32, #tpu.memory_space<vmem>>, vector<16x1xf32>
    tpu.vector_store %arg4[%c0_84, %c26_85], %149 {strides = array<i32>} : memref<32x128xf32, #tpu.memory_space<vmem>>, vector<16x1xf32>,
    %151 = vector.extract_strided_slice %120 {offsets = [0, 14], sizes = [16, 1], strides = [1, 1]} : vector<16x32xf32> to vector<16x1xf32>
    %c0_86 = arith.constant 0 : index
    %c28_87 = arith.constant 28 : index
    %152 = vector.load %arg4[%c0_86, %c28_87] : memref<32x128xf32, #tpu.memory_space<vmem>>, vector<16x1xf32>
    tpu.vector_store %arg4[%c0_86, %c28_87], %151 {strides = array<i32>} : memref<32x128xf32, #tpu.memory_space<vmem>>, vector<16x1xf32>,
    %153 = vector.extract_strided_slice %120 {offsets = [0, 15], sizes = [16, 1], strides = [1, 1]} : vector<16x32xf32> to vector<16x1xf32>
    %c0_88 = arith.constant 0 : index
    %c30_89 = arith.constant 30 : index
    %154 = vector.load %arg4[%c0_88, %c30_89] : memref<32x128xf32, #tpu.memory_space<vmem>>, vector<16x1xf32>
    tpu.vector_store %arg4[%c0_88, %c30_89], %153 {strides = array<i32>} : memref<32x128xf32, #tpu.memory_space<vmem>>, vector<16x1xf32>,
    %155 = vector.extract_strided_slice %120 {offsets = [0, 16], sizes = [16, 1], strides = [1, 1]} : vector<16x32xf32> to vector<16x1xf32>
    %c0_90 = arith.constant 0 : index
    %c32_91 = arith.constant 32 : index
    %156 = vector.load %arg4[%c0_90, %c32_91] : memref<32x128xf32, #tpu.memory_space<vmem>>, vector<16x1xf32>
    tpu.vector_store %arg4[%c0_90, %c32_91], %155 {strides = array<i32>} : memref<32x128xf32, #tpu.memory_space<vmem>>, vector<16x1xf32>,
    %157 = vector.extract_strided_slice %120 {offsets = [0, 17], sizes = [16, 1], strides = [1, 1]} : vector<16x32xf32> to vector<16x1xf32>
    %c0_92 = arith.constant 0 : index
    %c34 = arith.constant 34 : index
    %158 = vector.load %arg4[%c0_92, %c34] : memref<32x128xf32, #tpu.memory_space<vmem>>, vector<16x1xf32>
    tpu.vector_store %arg4[%c0_92, %c34], %157 {strides = array<i32>} : memref<32x128xf32, #tpu.memory_space<vmem>>, vector<16x1xf32>,
    %159 = vector.extract_strided_slice %120 {offsets = [0, 18], sizes = [16, 1], strides = [1, 1]} : vector<16x32xf32> to vector<16x1xf32>
    %c0_93 = arith.constant 0 : index
    %c36 = arith.constant 36 : index
    %160 = vector.load %arg4[%c0_93, %c36] : memref<32x128xf32, #tpu.memory_space<vmem>>, vector<16x1xf32>
    tpu.vector_store %arg4[%c0_93, %c36], %159 {strides = array<i32>} : memref<32x128xf32, #tpu.memory_space<vmem>>, vector<16x1xf32>,
    %161 = vector.extract_strided_slice %120 {offsets = [0, 19], sizes = [16, 1], strides = [1, 1]} : vector<16x32xf32> to vector<16x1xf32>
    %c0_94 = arith.constant 0 : index
    %c38 = arith.constant 38 : index
    %162 = vector.load %arg4[%c0_94, %c38] : memref<32x128xf32, #tpu.memory_space<vmem>>, vector<16x1xf32>
    tpu.vector_store %arg4[%c0_94, %c38], %161 {strides = array<i32>} : memref<32x128xf32, #tpu.memory_space<vmem>>, vector<16x1xf32>,
    %163 = vector.extract_strided_slice %120 {offsets = [0, 20], sizes = [16, 1], strides = [1, 1]} : vector<16x32xf32> to vector<16x1xf32>
    %c0_95 = arith.constant 0 : index
    %c40 = arith.constant 40 : index
    %164 = vector.load %arg4[%c0_95, %c40] : memref<32x128xf32, #tpu.memory_space<vmem>>, vector<16x1xf32>
    tpu.vector_store %arg4[%c0_95, %c40], %163 {strides = array<i32>} : memref<32x128xf32, #tpu.memory_space<vmem>>, vector<16x1xf32>,
    %165 = vector.extract_strided_slice %120 {offsets = [0, 21], sizes = [16, 1], strides = [1, 1]} : vector<16x32xf32> to vector<16x1xf32>
    %c0_96 = arith.constant 0 : index
    %c42 = arith.constant 42 : index
    %166 = vector.load %arg4[%c0_96, %c42] : memref<32x128xf32, #tpu.memory_space<vmem>>, vector<16x1xf32>
    tpu.vector_store %arg4[%c0_96, %c42], %165 {strides = array<i32>} : memref<32x128xf32, #tpu.memory_space<vmem>>, vector<16x1xf32>,
    %167 = vector.extract_strided_slice %120 {offsets = [0, 22], sizes = [16, 1], strides = [1, 1]} : vector<16x32xf32> to vector<16x1xf32>
    %c0_97 = arith.constant 0 : index
    %c44 = arith.constant 44 : index
    %168 = vector.load %arg4[%c0_97, %c44] : memref<32x128xf32, #tpu.memory_space<vmem>>, vector<16x1xf32>
    tpu.vector_store %arg4[%c0_97, %c44], %167 {strides = array<i32>} : memref<32x128xf32, #tpu.memory_space<vmem>>, vector<16x1xf32>,
    %169 = vector.extract_strided_slice %120 {offsets = [0, 23], sizes = [16, 1], strides = [1, 1]} : vector<16x32xf32> to vector<16x1xf32>
    %c0_98 = arith.constant 0 : index
    %c46 = arith.constant 46 : index
    %170 = vector.load %arg4[%c0_98, %c46] : memref<32x128xf32, #tpu.memory_space<vmem>>, vector<16x1xf32>
    tpu.vector_store %arg4[%c0_98, %c46], %169 {strides = array<i32>} : memref<32x128xf32, #tpu.memory_space<vmem>>, vector<16x1xf32>,
    %171 = vector.extract_strided_slice %120 {offsets = [0, 24], sizes = [16, 1], strides = [1, 1]} : vector<16x32xf32> to vector<16x1xf32>
    %c0_99 = arith.constant 0 : index
    %c48_100 = arith.constant 48 : index
    %172 = vector.load %arg4[%c0_99, %c48_100] : memref<32x128xf32, #tpu.memory_space<vmem>>, vector<16x1xf32>
    tpu.vector_store %arg4[%c0_99, %c48_100], %171 {strides = array<i32>} : memref<32x128xf32, #tpu.memory_space<vmem>>, vector<16x1xf32>,
    %173 = vector.extract_strided_slice %120 {offsets = [0, 25], sizes = [16, 1], strides = [1, 1]} : vector<16x32xf32> to vector<16x1xf32>
    %c0_101 = arith.constant 0 : index
    %c50 = arith.constant 50 : index
    %174 = vector.load %arg4[%c0_101, %c50] : memref<32x128xf32, #tpu.memory_space<vmem>>, vector<16x1xf32>
    tpu.vector_store %arg4[%c0_101, %c50], %173 {strides = array<i32>} : memref<32x128xf32, #tpu.memory_space<vmem>>, vector<16x1xf32>,
    %175 = vector.extract_strided_slice %120 {offsets = [0, 26], sizes = [16, 1], strides = [1, 1]} : vector<16x32xf32> to vector<16x1xf32>
    %c0_102 = arith.constant 0 : index
    %c52 = arith.constant 52 : index
    %176 = vector.load %arg4[%c0_102, %c52] : memref<32x128xf32, #tpu.memory_space<vmem>>, vector<16x1xf32>
    tpu.vector_store %arg4[%c0_102, %c52], %175 {strides = array<i32>} : memref<32x128xf32, #tpu.memory_space<vmem>>, vector<16x1xf32>,
    %177 = vector.extract_strided_slice %120 {offsets = [0, 27], sizes = [16, 1], strides = [1, 1]} : vector<16x32xf32> to vector<16x1xf32>
    %c0_103 = arith.constant 0 : index
    %c54 = arith.constant 54 : index
    %178 = vector.load %arg4[%c0_103, %c54] : memref<32x128xf32, #tpu.memory_space<vmem>>, vector<16x1xf32>
    tpu.vector_store %arg4[%c0_103, %c54], %177 {strides = array<i32>} : memref<32x128xf32, #tpu.memory_space<vmem>>, vector<16x1xf32>,
    %179 = vector.extract_strided_slice %120 {offsets = [0, 28], sizes = [16, 1], strides = [1, 1]} : vector<16x32xf32> to vector<16x1xf32>
    %c0_104 = arith.constant 0 : index
    %c56 = arith.constant 56 : index
    %180 = vector.load %arg4[%c0_104, %c56] : memref<32x128xf32, #tpu.memory_space<vmem>>, vector<16x1xf32>
    tpu.vector_store %arg4[%c0_104, %c56], %179 {strides = array<i32>} : memref<32x128xf32, #tpu.memory_space<vmem>>, vector<16x1xf32>,
    %181 = vector.extract_strided_slice %120 {offsets = [0, 29], sizes = [16, 1], strides = [1, 1]} : vector<16x32xf32> to vector<16x1xf32>
    %c0_105 = arith.constant 0 : index
    %c58 = arith.constant 58 : index
    %182 = vector.load %arg4[%c0_105, %c58] : memref<32x128xf32, #tpu.memory_space<vmem>>, vector<16x1xf32>
    tpu.vector_store %arg4[%c0_105, %c58], %181 {strides = array<i32>} : memref<32x128xf32, #tpu.memory_space<vmem>>, vector<16x1xf32>,
    %183 = vector.extract_strided_slice %120 {offsets = [0, 30], sizes = [16, 1], strides = [1, 1]} : vector<16x32xf32> to vector<16x1xf32>
    %c0_106 = arith.constant 0 : index
    %c60 = arith.constant 60 : index
    %184 = vector.load %arg4[%c0_106, %c60] : memref<32x128xf32, #tpu.memory_space<vmem>>, vector<16x1xf32>
    tpu.vector_store %arg4[%c0_106, %c60], %183 {strides = array<i32>} : memref<32x128xf32, #tpu.memory_space<vmem>>, vector<16x1xf32>,
    %185 = vector.extract_strided_slice %120 {offsets = [0, 31], sizes = [16, 1], strides = [1, 1]} : vector<16x32xf32> to vector<16x1xf32>
    %c0_107 = arith.constant 0 : index
    %c62 = arith.constant 62 : index
    %186 = vector.load %arg4[%c0_107, %c62] : memref<32x128xf32, #tpu.memory_space<vmem>>, vector<16x1xf32>
    tpu.vector_store %arg4[%c0_107, %c62], %185 {strides = array<i32>} : memref<32x128xf32, #tpu.memory_space<vmem>>, vector<16x1xf32>,
    %c0_108 = arith.constant 0 : index
    %c0_109 = arith.constant 0 : index
    %187 = vector.load %arg4[%c0_108, %c0_109] : memref<32x128xf32, #tpu.memory_space<vmem>>, vector<16x63xf32>
    %c112 = arith.constant 112 : index
    %c0_110 = arith.constant 0 : index
    %188 = vector.load %arg2[%c112, %c0_110] : memref<160x256xf32, #tpu.memory_space<vmem>>, vector<8x65xf32>
    %cst_111 = arith.constant 0.000000e+00 : f32
    %189 = vector.broadcast %cst_111 : f32 to vector<16x2xf32>
    %190 = tpu.concatenate %189, %187, %189 in 1 : vector<16x2xf32>, vector<16x63xf32>, vector<16x2xf32> -> vector<16x67xf32>
    %191 = vector.extract_strided_slice %190 {offsets = [0, 0], sizes = [16, 64], strides = [1, 1]} : vector<16x67xf32> to vector<16x64xf32>
    %192 = vector.extract_strided_slice %190 {offsets = [0, 1], sizes = [16, 64], strides = [1, 1]} : vector<16x67xf32> to vector<16x64xf32>
    %193 = vector.extract_strided_slice %190 {offsets = [0, 2], sizes = [16, 64], strides = [1, 1]} : vector<16x67xf32> to vector<16x64xf32>
    %194 = vector.extract_strided_slice %190 {offsets = [0, 3], sizes = [16, 64], strides = [1, 1]} : vector<16x67xf32> to vector<16x64xf32>
    %cst_112 = arith.constant 1.000000e+00 : f32
    %195 = vector.broadcast %cst_112 : f32 to vector<1x64xf32>
    %196 = tpu.concatenate %191, %192, %193, %194, %195 in 0 : vector<16x64xf32>, vector<16x64xf32>, vector<16x64xf32>, vector<16x64xf32>, vector<1x64xf32> -> vector<65x64xf32>
    %cst_113 = arith.constant dense<0.000000e+00> : vector<8x64xf32>
    %197 = tpu.matmul %188, %196, %cst_113 {dimension_numbers = #tpu.dot_dimension_numbers<[1], [0], [0], [1], [0, 0, 1, 1], [], []>} : vector<8x65xf32>, vector<65x64xf32>, vector<8x64xf32> -> vector<8x64xf32>
    %cst_114 = arith.constant 1.000000e-01 : f32
    %198 = vector.broadcast %cst_114 : f32 to vector<8x64xf32>
    %199 = arith.mulf %198, %197 : vector<8x64xf32>
    %200 = arith.maximumf %197, %199 : vector<8x64xf32>
    %c120 = arith.constant 120 : index
    %c0_115 = arith.constant 0 : index
    %201 = vector.load %arg2[%c120, %c0_115] : memref<160x256xf32, #tpu.memory_space<vmem>>, vector<8x25xf32>
    %cst_116 = arith.constant 0.000000e+00 : f32
    %202 = vector.broadcast %cst_116 : f32 to vector<8x1xf32>
    %203 = tpu.concatenate %202, %200, %202 in 1 : vector<8x1xf32>, vector<8x64xf32>, vector<8x1xf32> -> vector<8x66xf32>
    %204 = vector.extract_strided_slice %203 {offsets = [0, 0], sizes = [8, 64], strides = [1, 1]} : vector<8x66xf32> to vector<8x64xf32>
    %205 = vector.extract_strided_slice %203 {offsets = [0, 1], sizes = [8, 64], strides = [1, 1]} : vector<8x66xf32> to vector<8x64xf32>
    %206 = vector.extract_strided_slice %203 {offsets = [0, 2], sizes = [8, 64], strides = [1, 1]} : vector<8x66xf32> to vector<8x64xf32>
    %cst_117 = arith.constant 1.000000e+00 : f32
    %207 = vector.broadcast %cst_117 : f32 to vector<1x64xf32>
    %208 = tpu.concatenate %204, %205, %206, %207 in 0 : vector<8x64xf32>, vector<8x64xf32>, vector<8x64xf32>, vector<1x64xf32> -> vector<25x64xf32>
    %cst_118 = arith.constant dense<0.000000e+00> : vector<8x64xf32>
    %209 = tpu.matmul %201, %208, %cst_118 {dimension_numbers = #tpu.dot_dimension_numbers<[1], [0], [0], [1], [0, 0, 1, 1], [], []>} : vector<8x25xf32>, vector<25x64xf32>, vector<8x64xf32> -> vector<8x64xf32>
    %210 = arith.addf %197, %209 : vector<8x64xf32>
    %cst_119 = arith.constant 1.000000e-01 : f32
    %211 = vector.broadcast %cst_119 : f32 to vector<8x64xf32>
    %212 = arith.mulf %211, %210 : vector<8x64xf32>
    %213 = arith.maximumf %210, %212 : vector<8x64xf32>
    %c128 = arith.constant 128 : index
    %c0_120 = arith.constant 0 : index
    %214 = vector.load %arg2[%c128, %c0_120] : memref<160x256xf32, #tpu.memory_space<vmem>>, vector<8x25xf32>
    %cst_121 = arith.constant 0.000000e+00 : f32
    %215 = vector.broadcast %cst_121 : f32 to vector<8x3xf32>
    %216 = tpu.concatenate %215, %213, %215 in 1 : vector<8x3xf32>, vector<8x64xf32>, vector<8x3xf32> -> vector<8x70xf32>
    %217 = vector.extract_strided_slice %216 {offsets = [0, 0], sizes = [8, 64], strides = [1, 1]} : vector<8x70xf32> to vector<8x64xf32>
    %218 = vector.extract_strided_slice %216 {offsets = [0, 3], sizes = [8, 64], strides = [1, 1]} : vector<8x70xf32> to vector<8x64xf32>
    %219 = vector.extract_strided_slice %216 {offsets = [0, 6], sizes = [8, 64], strides = [1, 1]} : vector<8x70xf32> to vector<8x64xf32>
    %cst_122 = arith.constant 1.000000e+00 : f32
    %220 = vector.broadcast %cst_122 : f32 to vector<1x64xf32>
    %221 = tpu.concatenate %217, %218, %219, %220 in 0 : vector<8x64xf32>, vector<8x64xf32>, vector<8x64xf32>, vector<1x64xf32> -> vector<25x64xf32>
    %cst_123 = arith.constant dense<0.000000e+00> : vector<8x64xf32>
    %222 = tpu.matmul %214, %221, %cst_123 {dimension_numbers = #tpu.dot_dimension_numbers<[1], [0], [0], [1], [0, 0, 1, 1], [], []>} : vector<8x25xf32>, vector<25x64xf32>, vector<8x64xf32> -> vector<8x64xf32>
    %223 = arith.addf %210, %222 : vector<8x64xf32>
    %cst_124 = arith.constant 1.000000e-01 : f32
    %224 = vector.broadcast %cst_124 : f32 to vector<8x64xf32>
    %225 = arith.mulf %224, %197 : vector<8x64xf32>
    %226 = arith.maximumf %197, %225 : vector<8x64xf32>
    %c136 = arith.constant 136 : index
    %c0_125 = arith.constant 0 : index
    %227 = vector.load %arg2[%c136, %c0_125] : memref<160x256xf32, #tpu.memory_space<vmem>>, vector<8x25xf32>
    %cst_126 = arith.constant 0.000000e+00 : f32
    %228 = vector.broadcast %cst_126 : f32 to vector<8x1xf32>
    %229 = tpu.concatenate %228, %226, %228 in 1 : vector<8x1xf32>, vector<8x64xf32>, vector<8x1xf32> -> vector<8x66xf32>
    %230 = vector.extract_strided_slice %229 {offsets = [0, 0], sizes = [8, 64], strides = [1, 1]} : vector<8x66xf32> to vector<8x64xf32>
    %231 = vector.extract_strided_slice %229 {offsets = [0, 1], sizes = [8, 64], strides = [1, 1]} : vector<8x66xf32> to vector<8x64xf32>
    %232 = vector.extract_strided_slice %229 {offsets = [0, 2], sizes = [8, 64], strides = [1, 1]} : vector<8x66xf32> to vector<8x64xf32>
    %cst_127 = arith.constant 1.000000e+00 : f32
    %233 = vector.broadcast %cst_127 : f32 to vector<1x64xf32>
    %234 = tpu.concatenate %230, %231, %232, %233 in 0 : vector<8x64xf32>, vector<8x64xf32>, vector<8x64xf32>, vector<1x64xf32> -> vector<25x64xf32>
    %cst_128 = arith.constant dense<0.000000e+00> : vector<8x64xf32>
    %235 = tpu.matmul %227, %234, %cst_128 {dimension_numbers = #tpu.dot_dimension_numbers<[1], [0], [0], [1], [0, 0, 1, 1], [], []>} : vector<8x25xf32>, vector<25x64xf32>, vector<8x64xf32> -> vector<8x64xf32>
    %236 = arith.addf %197, %235 : vector<8x64xf32>
    %cst_129 = arith.constant 1.000000e-01 : f32
    %237 = vector.broadcast %cst_129 : f32 to vector<8x64xf32>
    %238 = arith.mulf %237, %236 : vector<8x64xf32>
    %239 = arith.maximumf %236, %238 : vector<8x64xf32>
    %c144 = arith.constant 144 : index
    %c0_130 = arith.constant 0 : index
    %240 = vector.load %arg2[%c144, %c0_130] : memref<160x256xf32, #tpu.memory_space<vmem>>, vector<8x25xf32>
    %cst_131 = arith.constant 0.000000e+00 : f32
    %241 = vector.broadcast %cst_131 : f32 to vector<8x3xf32>
    %242 = tpu.concatenate %241, %239, %241 in 1 : vector<8x3xf32>, vector<8x64xf32>, vector<8x3xf32> -> vector<8x70xf32>
    %243 = vector.extract_strided_slice %242 {offsets = [0, 0], sizes = [8, 64], strides = [1, 1]} : vector<8x70xf32> to vector<8x64xf32>
    %244 = vector.extract_strided_slice %242 {offsets = [0, 3], sizes = [8, 64], strides = [1, 1]} : vector<8x70xf32> to vector<8x64xf32>
    %245 = vector.extract_strided_slice %242 {offsets = [0, 6], sizes = [8, 64], strides = [1, 1]} : vector<8x70xf32> to vector<8x64xf32>
    %cst_132 = arith.constant 1.000000e+00 : f32
    %246 = vector.broadcast %cst_132 : f32 to vector<1x64xf32>
    %247 = tpu.concatenate %243, %244, %245, %246 in 0 : vector<8x64xf32>, vector<8x64xf32>, vector<8x64xf32>, vector<1x64xf32> -> vector<25x64xf32>
    %cst_133 = arith.constant dense<0.000000e+00> : vector<8x64xf32>
    %248 = tpu.matmul %240, %247, %cst_133 {dimension_numbers = #tpu.dot_dimension_numbers<[1], [0], [0], [1], [0, 0, 1, 1], [], []>} : vector<8x25xf32>, vector<25x64xf32>, vector<8x64xf32> -> vector<8x64xf32>
    %249 = arith.addf %236, %248 : vector<8x64xf32>
    %250 = arith.addf %223, %249 : vector<8x64xf32>
    %cst_134 = arith.constant 5.000000e-01 : f32
    %251 = vector.broadcast %cst_134 : f32 to vector<8x64xf32>
    %252 = arith.mulf %250, %251 : vector<8x64xf32>
    %cst_135 = arith.constant 1.000000e-01 : f32
    %253 = vector.broadcast %cst_135 : f32 to vector<8x64xf32>
    %254 = arith.mulf %253, %252 : vector<8x64xf32>
    %255 = arith.maximumf %252, %254 : vector<8x64xf32>
    %c152 = arith.constant 152 : index
    %c0_136 = arith.constant 0 : index
    %256 = vector.load %arg2[%c152, %c0_136] : memref<160x256xf32, #tpu.memory_space<vmem>>, vector<8x57xf32>
    %cst_137 = arith.constant 0.000000e+00 : f32
    %257 = vector.broadcast %cst_137 : f32 to vector<8x3xf32>
    %258 = tpu.concatenate %257, %255, %257 in 1 : vector<8x3xf32>, vector<8x64xf32>, vector<8x3xf32> -> vector<8x70xf32>
    %259 = vector.extract_strided_slice %258 {offsets = [0, 0], sizes = [8, 64], strides = [1, 1]} : vector<8x70xf32> to vector<8x64xf32>
    %260 = vector.extract_strided_slice %258 {offsets = [0, 1], sizes = [8, 64], strides = [1, 1]} : vector<8x70xf32> to vector<8x64xf32>
    %261 = vector.extract_strided_slice %258 {offsets = [0, 2], sizes = [8, 64], strides = [1, 1]} : vector<8x70xf32> to vector<8x64xf32>
    %262 = vector.extract_strided_slice %258 {offsets = [0, 3], sizes = [8, 64], strides = [1, 1]} : vector<8x70xf32> to vector<8x64xf32>
    %263 = vector.extract_strided_slice %258 {offsets = [0, 4], sizes = [8, 64], strides = [1, 1]} : vector<8x70xf32> to vector<8x64xf32>
    %264 = vector.extract_strided_slice %258 {offsets = [0, 5], sizes = [8, 64], strides = [1, 1]} : vector<8x70xf32> to vector<8x64xf32>
    %265 = vector.extract_strided_slice %258 {offsets = [0, 6], sizes = [8, 64], strides = [1, 1]} : vector<8x70xf32> to vector<8x64xf32>
    %cst_138 = arith.constant 1.000000e+00 : f32
    %266 = vector.broadcast %cst_138 : f32 to vector<1x64xf32>
    %267 = tpu.concatenate %259, %260, %261, %262, %263, %264, %265, %266 in 0 : vector<8x64xf32>, vector<8x64xf32>, vector<8x64xf32>, vector<8x64xf32>, vector<8x64xf32>, vector<8x64xf32>, vector<8x64xf32>, vector<1x64xf32> -> vector<57x64xf32>
    %cst_139 = arith.constant dense<0.000000e+00> : vector<8x64xf32>
    %268 = tpu.matmul %256, %267, %cst_139 {dimension_numbers = #tpu.dot_dimension_numbers<[1], [0], [0], [1], [0, 0, 1, 1], [], []>} : vector<8x57xf32>, vector<57x64xf32>, vector<8x64xf32> -> vector<8x64xf32>
    %269 = vector.extract_strided_slice %268 {offsets = [0, 0], sizes = [1, 64], strides = [1, 1]} : vector<8x64xf32> to vector<1x64xf32>
    %270 = math.tanh %269 : vector<1x64xf32>
    %c0_140 = arith.constant 0 : index
    %c0_141 = arith.constant 0 : index
    %c0_142 = arith.constant 0 : index
    %271 = vector.load %arg3[%c0_140, %c0_141, %c0_142] : memref<1x1x64xf32, #tpu.memory_space<vmem>>, vector<1x1x64xf32>
    %272 = vector.shape_cast %271 : vector<1x1x64xf32> to vector<1x64xf32>
    %273 = vector.shape_cast %270 : vector<1x64xf32> to vector<1x1x64xf32>
    tpu.vector_store %arg3[%c0_140, %c0_141, %c0_142], %273 {strides = array<i32>} : memref<1x1x64xf32, #tpu.memory_space<vmem>>, vector<1x1x64xf32>,
    return
  }
  func.func @transform_0(%arg0: i32) -> (i32, i32, i32) {
    %c0_i32 = arith.constant 0 : i32
    %c0_i32_0 = arith.constant 0 : i32
    %c0_i32_1 = arith.constant 0 : i32
    return %arg0, %c0_i32, %c0_i32_0 : i32, i32, i32
  }
  func.func @transform_1(%arg0: i32) -> (i32, i32) {
    %c0_i32 = arith.constant 0 : i32
    %c0_i32_0 = arith.constant 0 : i32
    %c0_i32_1 = arith.constant 0 : i32
    return %c0_i32, %c0_i32_0 : i32, i32
  }
  func.func @transform_2(%arg0: i32) -> (i32, i32, i32) {
    %c0_i32 = arith.constant 0 : i32
    %c0_i32_0 = arith.constant 0 : i32
    %c0_i32_1 = arith.constant 0 : i32
    return %arg0, %c0_i32, %c0_i32_0 : i32, i32, i32
  }
}

</mosaic_0001>

<bundles_post_ra>
// kernel: tpu_custom_call.1
= control target key start
LH: loop header
LB: loop body
LE: loop exit
PB: predicated region body
PF: predicated region fallthrough
CT: control target
= control target key end

     0   :  { %7 = vsyncpa [#allocation4], 0  ;;  %s3474_s0 = inlined_call_operand.hbm [shape: f32[2,8,16], index: 0, kind: input, shape index: {}]   ;;  %s3475_s1 = inlined_call_operand.hbm [shape: f32[160,256], index: 1, kind: input, shape index: {}]   ;;  %s3476_s2 = inlined_call_operand.hbm [shape: f32[2,1,64], index: 2, kind: output, shape index: {}]  }
   0x1   :  { %9 = vsyncpa [#allocation4 + $0x1], 0 }
   0x2   :  { %10 = vsyncpa [#allocation7], 0 }
   0x3   :  { %11 = vsyncpa [#allocation5], 0 }
   0x4   :  { %13 = vsyncpa [#allocation5 + $0x1], 0  ;;  %s2711_s9 = smov 0   ;;  %s2713_s10 = smov 0  }
   0x5   :  { %s2715_s11 = smov 0   ;;  %s2717_s12 = smov 0  }
   0x6 LB: > { %s2732_s13 = sadd.s32 4294967295, %s2649_s12   ;;  %s2101_s14 = sadd.s32 4294967294, %s2649_s12   ;;  %s2649_s12 = sphi %s2717_s12, %s3529_s12   ;;  %s2645_s11 = sphi %s2715_s11, %s3528_s11   ;;  %s2641_s10 = sphi %s2713_s10, %s3527_s10   ;;  %s2637_s9 = sphi %s2711_s9, %s3526_s9  }
   0x7   : > { %p39_p0 = scmp.ne.s32.totalorder %s2641_s10, %s2637_s9  ;;  %p3477_p1 = scmp.eq.s32.totalorder %s2732_s13, 0 }
   0x8   : > { %p90_p3 = scmp.eq.s32.totalorder %s2101_s14, 1  ;;  %p2102_p5 = scmp.ge.s32.totalorder %s2649_s12, 1 }
   0x9   : > { %p2741_p4 = por %p3477_p1, %p39_p0  ;;  %p97_p7 = scmp.lt.s32.totalorder %s2649_s12, 3 }
   0xa   : > { %p2746_p6 = por %p90_p3, %p39_p0  ;;  %s2651_s18 = smov [#allocation6]  }
   0xb   : > { %s3494_s15 = scalar_select %p2741_p4, 1, 0 }
   0xc   : > { %s3495_s16 = scalar_select %p2746_p6, 1, 0 }
   0xd   : > { %p2751_p8 = pnand %p2102_p5, %p97_p7  ;;  %s109_s19 = sshll.u32 %s2651_s18, 4  ;;  %s110_s19 = int_to_ptr.vmem [resolvable:$true] %s109_s19 }
   0xe   : > { %s2765_s21 = sadd.s32 1, %s2649_s12   ;;  %s26_s22 = sadd.s32 1, %s2645_s11 }
   0xf   : > { %s3496_s17 = scalar_select %p2751_p8, 1, 0 }
  0x10   : > { %p2434_p9 = pneg %p2751_p8  ;;  %s23_s23 = ssub.s32 %s2649_s12, %s2765_s21 }
  0x11   : > { %s2538_s24 = scalar_lea.vmem %s110_s19, 5120  ;;  %p2546_p5 = scmp.lt.s32.totalorder %s110_s19, %s110_s19 }
  0x12   : > { %p2760_p11 = pnand %p2434_p9, %p3477_p1  ;;  %p2539_p13 = scmp.ne.s32.totalorder %s110_s19, %s2538_s24 }
  0x13   : > { %p2547_p7 = scmp.lt.s32.totalorder %s2538_s24, %s2538_s24 }
  0x14   : > { %p2529_p12 = pneg %p2760_p11 }
  0x15   : > { %p2548_p10 = por %p2547_p7, %p2546_p5 }
  0x16   : > { %p2541_p0 = pnand %p2539_p13, %p2529_p12 }
  0x18   : > { %p2542_p3 = pneg %p2541_p0 }
  0x1a   : > { %p2549_p2 = pnand %p2548_p10, %p2542_p3 }
  0x1c   : > { %2552 = shalt.err (!%p2549_p2)
}
  0x1d   : > { %s2652_s25 = smov 256   ;;  %s2653_s26 = smov 16  }
  0x1e   : > { %2437 = dma.hbm_to_vmem [thread:$0]  (!%p2760_p11), %s3475_s1, 5120, %s110_s19, [#allocation7], %s2652_s25, %s2652_s25, %s2653_s26  }
  0x1f   : > { %p24_p9 = scmp.eq.s32.totalorder %s23_s23, 0  ;;  %p33_p12 = scmp.ne.s32.totalorder %s2645_s11, %s2641_s10 }
  0x20   : > { %p34_p10 = scmp.eq.s32.totalorder %s2649_s12, 0  ;;  %p2447_p2 = scmp.lt.s32.totalorder %s2649_s12, 2 }
  0x21   : > { %s2782_s29 = scalar_select %p24_p9, %s2645_s11, %s26_s22  }
  0x22   : > { %p35_p13 = por %p34_p10, %p33_p12  ;;  %p3498_p0 = scmp.eq.s32.totalorder %s2732_s13, 1 }
  0x23   : > { %s123_s3 = sand.u32 1, %s2645_s11   ;;  %s2106_s4 = sshll.u32 %s2649_s12, 7 }
  0x24   : > { %p2786_p3 = por %p3498_p0, %p33_p12  ;;  %s2105_s5 = sshll.u32 %s123_s3, 3 }
  0x25   : > { %s2795_s8 = scalar_lea.hbm %s3474_s0, %s2106_s4  ;;  %s127_s14 = scalar_lea.vmem [#allocation3], %s2105_s5 }
  0x26   : > { %s3499_s30 = scalar_select %p2786_p3, 1, 0 }
  0x27   : > { %s134_s18 = sshll.u32 %s127_s14, 4  ;;  %p2797_p11 = pnand %p2447_p2, %p35_p13  ;;  %s135_s18 = int_to_ptr.vmem [resolvable:$true] %s134_s18 }
  0x28   : > { %s124_s20 = scalar_lea.sflag [#allocation4], %s123_s3  ;;  %s2553_s22 = scalar_lea.hbm %s2795_s8, 128 }
  0x29   : > { %p2554_p5 = scmp.ne.s32.totalorder %s2795_s8, %s2553_s22  ;;  %p2555_p7 = pneg %p2797_p11 }
  0x2a   : > { %s2558_s25 = scalar_lea.hbm %s3474_s0, 256  ;;  %p2559_p10 = scmp.lt.s32.totalorder %s2795_s8, %s3474_s0 }
  0x2b   : > { %p2556_p9 = pnand %p2555_p7, %p2554_p5  ;;  %p2560_p2 = scmp.lt.s32.totalorder %s2558_s25, %s2553_s22 }
  0x2d   : > { %p2557_p12 = pneg %p2556_p9  ;;  %p2561_p13 = por %p2560_p2, %p2559_p10 }
  0x2f   : > { %p2562_p0 = pnand %p2561_p13, %p2557_p12 }
  0x31   : > { %2565 = shalt.err (!%p2562_p0)
}
  0x32   : > { %s2566_s28 = scalar_lea.vmem %s135_s18, 128  ;;  %s2654_s3 = smov [#allocation3]  }
  0x33   : > { %p2567_p1 = scmp.ne.s32.totalorder %s135_s18, %s2566_s28  ;;  %s2571_s4 = sshll.u32 %s2654_s3, 4  ;;  %s2572_s4 = int_to_ptr.vmem [resolvable:$false] %s2571_s4 }
  0x34   : > { %s2573_s5 = scalar_lea.vmem %s2572_s4, 256  ;;  %p2574_p5 = scmp.lt.s32.totalorder %s135_s18, %s2572_s4 }
  0x35   : > { %p2569_p6 = pnand %p2567_p1, %p2555_p7  ;;  %p2575_p9 = scmp.lt.s32.totalorder %s2573_s5, %s2566_s28 }
  0x37   : > { %p2570_p3 = pneg %p2569_p6  ;;  %p2576_p4 = por %p2575_p9, %p2574_p5 }
  0x39   : > { %p2577_p8 = pnand %p2576_p4, %p2570_p3 }
  0x3b   : > { %2580 = shalt.err (!%p2577_p8)
}
  0x3c   : > { %2441 = dma.hbm_to_vmem [thread:$0]  (!%p2797_p11), %s2795_s8, 128, %s135_s18, %s124_s20  }
  0x3d   : > { %p3501_p12 = scmp.ne.s32.totalorder %s3496_s17, 0 }
  0x3e   : > { %s2818_s6 = sand.u32 (!%p3501_p12), 1, %s2641_s10   ;;  %p3502_p1 = scmp.ne.s32.totalorder (!%p3501_p12), %s3494_s15, 0 }
  0x3f   : > { %143 = sbr.rel (%p3501_p12) target bundleno = 4156 (0x103c), region = 28  ;;  %s2108_s7 = sshll.u32 (!%p3501_p12), %s2818_s6, 3 }
  0x40   : > { %s146_s14 = scalar_lea.sflag (!%p3501_p12), [#allocation4], %s2818_s6  ;;  %s149_s22 = scalar_lea.vmem (!%p3501_p12), [#allocation3], %s2108_s7 }
  0x44   : > { %2624 = dma.done.wait (%p3502_p1), %s146_s14, 128  }
  0x45   : > { %2626 = vsyncadd (%p3502_p1), %s146_s14, 4294967168  ;;  %p3503_p4 = scmp.eq.s32.totalorder %s2732_s13, 0 }
  0x47   : > { %2628 = dma.done.wait (%p3503_p4), [#allocation7], 5120   ;;  %p3504_p6 = pmov %p3503_p4 }
  0x48   : > { %vm218_vm0 = vcmask 1040384   ;;  %v2655_v0 = vmov 1.0   ;;  %v173_v1 = vld [vmem:[%s149_s22] sm:$0xff]  ;;  %s2656_s17 = smov 3   ;;  %vm3493_vm1 = vcmask 23552   ;;  %vm184_vm2 = vcmask 154624  }
  0x49   : > { %2630 = vsyncadd (%p3504_p6), [#allocation7], 4294962176  ;;  %2252 = vmatprep.subr.msk.mxu0 %vm218_vm0, %v2655_v0  ;;  %179 = vrot.lane.b32.xlu0 %v173_v1, %s2656_s17  ;;  %v174_v5 = vld [vmem:[#allocation6] sm:$0xff]  ;;  %vm3485_vm3 = vcmask 465920   ;;  %s3482_s15 = smov 123   ;;  %s3491_s8 = smov 122  }
  0x4a   : > { %2253 = vmatpush3.msk.msra.mxu0 %vm218_vm0, %v2655_v0  ;;  %2268 = vmatprep.mubr.msk.f32.mxu0 %vm3485_vm3, %v174_v5  ;;  %s3481_s18 = smov 124   ;;  %s2660_s19 = smov 125   ;;  %v175_v12 = vld [vmem:[#allocation6 + $0x10] sm:$0xff]  ;;  %v176_v13 = vld [vmem:[#allocation6 + $0x20] sm:$0xff]  ;;  %vm315_vm4 = vcmask 252928   ;;  %v2663_v15 = vmov 0.0  }
  0x4b   : > { %s2661_s20 = smov 126   ;;  %s2662_s23 = smov 127   ;;  %v177_v14 = vld [vmem:[#allocation6 + $0x30] sm:$0xff]  ;;  %317 = vst.msk [vmem:[#allocation2 + $0x8] sm:$0xff] %vm315_vm4, %v2663_v15  ;;  %316 = vst.msk [vmem:[#allocation2] sm:$0xff] %vm315_vm4, %v2663_v15  ;;  %664 = vmatprep.subr.mxu1 %v2663_v15  ;;  %vm320_vm5 = vcmask 7168  }
  0x4c   : > { %318 = vst.msk [vmem:[#allocation2 + $0x10] sm:$0xff] %vm315_vm4, %v2663_v15  ;;  %319 = vst.msk [vmem:[#allocation2 + $0x18] sm:$0xff] %vm315_vm4, %v2663_v15  ;;  %s2664_s24 = smov 2   ;;  %s2665_s25 = smov 1   ;;  %vm3487_vm6 = vcmask 23568   ;;  %vm3486_vm7 = vcmask 39968  }
  0x4d   : > { %s2666_s26 = smov 13   ;;  %s2667_s27 = smov 4   ;;  %vm375_vm8 = vcmask 56368   ;;  %vm392_vm9 = vcmask 72768   ;;  %vm409_vm10 = vcmask 89168   ;;  %vm426_vm11 = vcmask 105568  }
  0x4e   : > { %s2668_s28 = smov 5   ;;  %s3483_s3 = smov 6   ;;  %vm443_vm12 = vcmask 121968   ;;  %vm3488_vm13 = vcmask 138368   ;;  %vm477_vm14 = vcmask 154768   ;;  %vm494_vm15 = vcmask 171168  }
  0x4f   : > { %s2670_s4 = smov 7   ;;  %s2671_s5 = smov 8   ;;  %vm3490_vm4 = vcmask 203968  }
  0x50   : > { %s2672_s7 = smov 9   ;;  %s2673_s14 = smov 10  }
  0x51   : > { %s2674_s22 = smov 11   ;;  %p3523_p3 = scmp.ne.s32.totalorder %s3499_s30, 0 }
  0xbb   : > { %v180_v2 = vpop.permute.xlu0 %179 }
  0xbc   : > { %v183_v3 = vsel %vm3493_vm1, 0.0, %v180_v2 }
  0xbd   : > { %v185_v4 = vsel %vm184_vm2, %v183_v3, 0.0 }
  0xbe   : > { %199 = vrot.lane.b32.xlu1 %v185_v4, %s3482_s15  ;;  %202 = vrot.lane.b32.xlu0 %v185_v4, %s3491_s8  ;;  %s2676_s15 = smov 14  }
  0xc2   : > { %196 = vrot.lane.b32.xlu1 %v185_v4, %s3481_s18  ;;  %193 = vrot.lane.b32.xlu0 %v185_v4, %s2660_s19  ;;  %s2675_s18 = smov 12  }
  0xc6   : > { %190 = vrot.lane.b32.xlu1 %v185_v4, %s2661_s20  ;;  %187 = vrot.lane.b32.xlu0 %v185_v4, %s2662_s23 }
 0x130   : > { %v200_v6 = vpop.permute.xlu1 %199  ;;  %v203_v7 = vpop.permute.xlu0 %202 }
 0x131   : > { %2254 = vmatprep.subr.mxu0 %v203_v7 }
 0x132   : > { %2255 = vmatpush3.msra.mxu0 %v203_v7 }
 0x133   : > { %2256 = vmatprep.subr.mxu0 %v200_v6 }
 0x134   : > { %v197_v8 = vpop.permute.xlu1 %196  ;;  %2257 = vmatpush3.msra.mxu0 %v200_v6  ;;  %v194_v9 = vpop.permute.xlu0 %193 }
 0x135   : > { %2258 = vmatprep.subr.mxu0 %v197_v8 }
 0x136   : > { %2259 = vmatpush3.msra.mxu0 %v197_v8 }
 0x137   : > { %2260 = vmatprep.subr.mxu0 %v194_v9 }
 0x138   : > { %v191_v10 = vpop.permute.xlu1 %190  ;;  %2261 = vmatpush3.msra.mxu0 %v194_v9  ;;  %v188_v11 = vpop.permute.xlu0 %187 }
 0x139   : > { %2262 = vmatprep.subr.mxu0 %v191_v10 }
 0x13a   : > { %2263 = vmatpush3.msra.mxu0 %v191_v10 }
 0x13b   : > { %2264 = vmatprep.subr.mxu0 %v188_v11 }
 0x13c   : > { %2265 = vmatpush3.msra.mxu0 %v188_v11 }
 0x13d   : > { %2266 = vmatprep.subr.msk.mxu0 %vm184_vm2, %v183_v3 }
 0x13e   : > { %2267 = vmatpush3.msk.msra.mxu0 %vm184_vm2, %v183_v3  ;;  %vm511_vm2 = vcmask 187568  }
 0x13f   : > { %2269 = vmatmul.mubr.msk.f32.vlgmr.msra.gmra.mxu0 %vm3485_vm3, %v175_v12  ;;  %2274 = vmatprep.subr.msk.mxu0 %vm218_vm0, %v2655_v0 }
 0x140   : > { %2271 = vmatprep.mubr.msk.f32.mxu0 %vm3485_vm3, %v176_v13  ;;  %2275 = vmatpush3.msk.msra.mxu0 %vm218_vm0, %v2655_v0 }
 0x143   : > { %2272 = vmatmul.mubr.msk.f32.gmra.mxu0 %vm3485_vm3, %v177_v14  ;;  %vm3489_vm3 = vcmask 220368  }
 0x1ff   : > { %v2270_v16 = vpop.f32.mrf.mxu0 }
 0x200   : > { %v308_v17 = vmul.f32 0.1, %v2270_v16 }
 0x201   : > { %v288_v18 = vpop.f32.mrf.mxu0 }
 0x202   : > { %v2858_v19 = vmax.f32 %v2270_v16, %v308_v17  ;;  %v307_v20 = vmul.f32 0.1, %v288_v18 }
 0x203   : > { %v2273_v21 = vpop.f32.mrf.mxu0 }
 0x204   : > { %v2860_v22 = vmax.f32 %v288_v18, %v307_v20  ;;  %348 = vrot.lane.b32.xlu0 %v2858_v19, %s2664_s24  ;;  %331 = vrot.lane.b32.xlu1 %v2858_v19, %s2665_s25  ;;  %v310_v23 = vmul.f32 0.1, %v2273_v21  ;;  %322 = vst.msk [vmem:[#allocation2 + $0x8] sm:$0xff] %vm320_vm5, %v2858_v19 }
 0x205   : > { %v298_v24 = vpop.f32.mrf.mxu0 }
 0x206   : > { %v2868_v25 = vmax.f32 %v2273_v21, %v310_v23  ;;  %v309_v26 = vmul.f32 0.1, %v298_v24  ;;  %321 = vst.msk [vmem:[#allocation2] sm:$0xff] %vm320_vm5, %v2860_v22 }
 0x208   : > { %365 = vrot.lane.b32.xlu0 %v2858_v19, %s2656_s17  ;;  %535 = vrot.lane.b32.xlu1 %v2858_v19, %s2666_s26  ;;  %v2876_v27 = vmax.f32 %v298_v24, %v309_v26  ;;  %324 = vst.msk [vmem:[#allocation2 + $0x18] sm:$0xff] %vm320_vm5, %v2868_v25 }
 0x20a   : > { %323 = vst.msk [vmem:[#allocation2 + $0x10] sm:$0xff] %vm320_vm5, %v2876_v27 }
 0x20c   : > { %382 = vrot.lane.b32.xlu0 %v2858_v19, %s2667_s27  ;;  %329 = vrot.lane.b32.xlu1 %v2860_v22, %s2665_s25 }
 0x210   : > { %399 = vrot.lane.b32.xlu0 %v2858_v19, %s2668_s28  ;;  %346 = vrot.lane.b32.xlu1 %v2860_v22, %s2664_s24 }
 0x214   : > { %416 = vrot.lane.b32.xlu0 %v2858_v19, %s3483_s3  ;;  %363 = vrot.lane.b32.xlu1 %v2860_v22, %s2656_s17 }
 0x218   : > { %433 = vrot.lane.b32.xlu0 %v2858_v19, %s2670_s4  ;;  %380 = vrot.lane.b32.xlu1 %v2860_v22, %s2667_s27 }
 0x21c   : > { %450 = vrot.lane.b32.xlu0 %v2858_v19, %s2671_s5  ;;  %397 = vrot.lane.b32.xlu1 %v2860_v22, %s2668_s28 }
 0x220   : > { %467 = vrot.lane.b32.xlu0 %v2858_v19, %s2672_s7  ;;  %414 = vrot.lane.b32.xlu1 %v2860_v22, %s3483_s3 }
 0x224   : > { %484 = vrot.lane.b32.xlu0 %v2858_v19, %s2673_s14  ;;  %431 = vrot.lane.b32.xlu1 %v2860_v22, %s2670_s4 }
 0x228   : > { %501 = vrot.lane.b32.xlu0 %v2858_v19, %s2674_s22  ;;  %448 = vrot.lane.b32.xlu1 %v2860_v22, %s2671_s5 }
 0x22c   : > { %518 = vrot.lane.b32.xlu0 %v2858_v19, %s2675_s18  ;;  %465 = vrot.lane.b32.xlu1 %v2860_v22, %s2672_s7 }
 0x230   : > { %499 = vrot.lane.b32.xlu0 %v2860_v22, %s2674_s22  ;;  %482 = vrot.lane.b32.xlu1 %v2860_v22, %s2673_s14 }
 0x234   : > { %516 = vrot.lane.b32.xlu1 %v2860_v22, %s2675_s18  ;;  %352 = vrot.lane.b32.xlu0 %v2868_v25, %s2664_s24 }
 0x238   : > { %369 = vrot.lane.b32.xlu0 %v2868_v25, %s2656_s17  ;;  %335 = vrot.lane.b32.xlu1 %v2868_v25, %s2665_s25 }
 0x23c   : > { %386 = vrot.lane.b32.xlu0 %v2868_v25, %s2667_s27  ;;  %403 = vrot.lane.b32.xlu1 %v2868_v25, %s2668_s28 }
 0x240   : > { %420 = vrot.lane.b32.xlu0 %v2868_v25, %s3483_s3  ;;  %333 = vrot.lane.b32.xlu1 %v2876_v27, %s2665_s25 }
 0x244   : > { %437 = vrot.lane.b32.xlu0 %v2868_v25, %s2670_s4  ;;  %350 = vrot.lane.b32.xlu1 %v2876_v27, %s2664_s24 }
 0x248   : > { %454 = vrot.lane.b32.xlu0 %v2868_v25, %s2671_s5  ;;  %533 = vrot.lane.b32.xlu1 %v2860_v22, %s2666_s26 }
 0x24c   : > { %471 = vrot.lane.b32.xlu0 %v2868_v25, %s2672_s7  ;;  %384 = vrot.lane.b32.xlu1 %v2876_v27, %s2667_s27 }
 0x250   : > { %488 = vrot.lane.b32.xlu0 %v2868_v25, %s2673_s14  ;;  %401 = vrot.lane.b32.xlu1 %v2876_v27, %s2668_s28 }
 0x254   : > { %505 = vrot.lane.b32.xlu0 %v2868_v25, %s2674_s22  ;;  %418 = vrot.lane.b32.xlu1 %v2876_v27, %s3483_s3  ;;  %s2677_s3 = smov 15  }
 0x258   : > { %522 = vrot.lane.b32.xlu0 %v2868_v25, %s2675_s18  ;;  %435 = vrot.lane.b32.xlu1 %v2876_v27, %s2670_s4 }
 0x25c   : > { %539 = vrot.lane.b32.xlu0 %v2868_v25, %s2666_s26  ;;  %452 = vrot.lane.b32.xlu1 %v2876_v27, %s2671_s5 }
 0x260   : > { %556 = vrot.lane.b32.xlu0 %v2868_v25, %s2676_s15  ;;  %469 = vrot.lane.b32.xlu1 %v2876_v27, %s2672_s7 }
 0x264   : > { %573 = vrot.lane.b32.xlu0 %v2868_v25, %s2677_s3  ;;  %486 = vrot.lane.b32.xlu1 %v2876_v27, %s2673_s14 }
 0x268   : > { %367 = vrot.lane.b32.xlu0 %v2876_v27, %s2656_s17  ;;  %503 = vrot.lane.b32.xlu1 %v2876_v27, %s2674_s22 }
 0x26c   : > { %552 = vrot.lane.b32.xlu0 %v2858_v19, %s2676_s15  ;;  %520 = vrot.lane.b32.xlu1 %v2876_v27, %s2675_s18 }
 0x270   : > { %569 = vrot.lane.b32.xlu0 %v2858_v19, %s2677_s3  ;;  %537 = vrot.lane.b32.xlu1 %v2876_v27, %s2666_s26 }
 0x274   : > { %571 = vrot.lane.b32.xlu0 %v2876_v27, %s2677_s3  ;;  %554 = vrot.lane.b32.xlu1 %v2876_v27, %s2676_s15 }
 0x276   : > { %v349_v28 = vpop.permute.xlu0 %348  ;;  %v332_v29 = vpop.permute.xlu1 %331 }
 0x277   : > { %343 = vst.msk [vmem:[#allocation2 + $0x8] sm:$0xff] %vm3487_vm6, %v332_v29 }
 0x278   : > { %567 = vrot.lane.b32.xlu0 %v2860_v22, %s2677_s3  ;;  %550 = vrot.lane.b32.xlu1 %v2860_v22, %s2676_s15  ;;  %360 = vst.msk [vmem:[#allocation2 + $0x8] sm:$0xff] %vm3486_vm7, %v349_v28 }
 0x27a   : > { %v366_v30 = vpop.permute.xlu0 %365  ;;  %v536_v31 = vpop.permute.xlu1 %535 }
 0x27b   : > { %377 = vst.msk [vmem:[#allocation2 + $0x8] sm:$0xff] %vm375_vm8, %v366_v30 }
 0x27e   : > { %v383_v32 = vpop.permute.xlu0 %382  ;;  %v330_v33 = vpop.permute.xlu1 %329 }
 0x27f   : > { %394 = vst.msk [vmem:[#allocation2 + $0x8] sm:$0xff] %vm392_vm9, %v383_v32 }
 0x280   : > { %342 = vst.msk [vmem:[#allocation2] sm:$0xff] %vm3487_vm6, %v330_v33 }
 0x282   : > { %v400_v34 = vpop.permute.xlu0 %399  ;;  %v347_v35 = vpop.permute.xlu1 %346 }
 0x283   : > { %411 = vst.msk [vmem:[#allocation2 + $0x8] sm:$0xff] %vm409_vm10, %v400_v34 }
 0x284   : > { %359 = vst.msk [vmem:[#allocation2] sm:$0xff] %vm3486_vm7, %v347_v35 }
 0x286   : > { %v417_v36 = vpop.permute.xlu0 %416  ;;  %v364_v37 = vpop.permute.xlu1 %363 }
 0x287   : > { %428 = vst.msk [vmem:[#allocation2 + $0x8] sm:$0xff] %vm426_vm11, %v417_v36 }
 0x288   : > { %376 = vst.msk [vmem:[#allocation2] sm:$0xff] %vm375_vm8, %v364_v37 }
 0x28a   : > { %v434_v38 = vpop.permute.xlu0 %433  ;;  %v381_v39 = vpop.permute.xlu1 %380 }
 0x28b   : > { %445 = vst.msk [vmem:[#allocation2 + $0x8] sm:$0xff] %vm443_vm12, %v434_v38 }
 0x28c   : > { %393 = vst.msk [vmem:[#allocation2] sm:$0xff] %vm392_vm9, %v381_v39 }
 0x28e   : > { %v451_v40 = vpop.permute.xlu0 %450  ;;  %v398_v41 = vpop.permute.xlu1 %397 }
 0x28f   : > { %462 = vst.msk [vmem:[#allocation2 + $0x8] sm:$0xff] %vm3488_vm13, %v451_v40 }
 0x290   : > { %410 = vst.msk [vmem:[#allocation2] sm:$0xff] %vm409_vm10, %v398_v41 }
 0x292   : > { %v468_v42 = vpop.permute.xlu0 %467  ;;  %v415_v43 = vpop.permute.xlu1 %414 }
 0x293   : > { %479 = vst.msk [vmem:[#allocation2 + $0x8] sm:$0xff] %vm477_vm14, %v468_v42  ;;  %v589_v42 = vld [vmem:[#allocation6 + $0x48] sm:$0xff] }
 0x294   : > { %427 = vst.msk [vmem:[#allocation2] sm:$0xff] %vm426_vm11, %v415_v43  ;;  %2121 = vmatprep.mubr.msk.f32.mxu1 %vm320_vm5, %v589_v42 }
 0x296   : > { %v485_v44 = vpop.permute.xlu0 %484  ;;  %v432_v45 = vpop.permute.xlu1 %431 }
 0x297   : > { %496 = vst.msk [vmem:[#allocation2 + $0x8] sm:$0xff] %vm494_vm15, %v485_v44 }
 0x298   : > { %444 = vst.msk [vmem:[#allocation2] sm:$0xff] %vm443_vm12, %v432_v45 }
 0x29a   : > { %v502_v46 = vpop.permute.xlu0 %501  ;;  %v449_v47 = vpop.permute.xlu1 %448 }
 0x29b   : > { %513 = vst.msk [vmem:[#allocation2 + $0x8] sm:$0xff] %vm511_vm2, %v502_v46 }
 0x29c   : > { %461 = vst.msk [vmem:[#allocation2] sm:$0xff] %vm3488_vm13, %v449_v47 }
 0x29e   : > { %v519_v48 = vpop.permute.xlu0 %518  ;;  %v466_v49 = vpop.permute.xlu1 %465 }
 0x29f   : > { %530 = vst.msk [vmem:[#allocation2 + $0x8] sm:$0xff] %vm3490_vm4, %v519_v48 }
 0x2a0   : > { %478 = vst.msk [vmem:[#allocation2] sm:$0xff] %vm477_vm14, %v466_v49 }
 0x2a1   : > { %547 = vst.msk [vmem:[#allocation2 + $0x8] sm:$0xff] %vm3489_vm3, %v536_v31 }
 0x2a2   : > { %v500_v50 = vpop.permute.xlu0 %499  ;;  %v483_v51 = vpop.permute.xlu1 %482 }
 0x2a3   : > { %495 = vst.msk [vmem:[#allocation2] sm:$0xff] %vm494_vm15, %v483_v51 }
 0x2a4   : > { %512 = vst.msk [vmem:[#allocation2] sm:$0xff] %vm511_vm2, %v500_v50 }
 0x2a6   : > { %v517_v52 = vpop.permute.xlu1 %516  ;;  %v353_v53 = vpop.permute.xlu0 %352 }
 0x2a7   : > { %529 = vst.msk [vmem:[#allocation2] sm:$0xff] %vm3490_vm4, %v517_v52 }
 0x2aa   : > { %v370_v54 = vpop.permute.xlu0 %369  ;;  %v336_v55 = vpop.permute.xlu1 %335 }
 0x2ab   : > { %345 = vst.msk [vmem:[#allocation2 + $0x18] sm:$0xff] %vm3487_vm6, %v336_v55  ;;  %v588_v55 = vld [vmem:[#allocation6 + $0x40] sm:$0xff] }
 0x2ac   : > { %362 = vst.msk [vmem:[#allocation2 + $0x18] sm:$0xff] %vm3486_vm7, %v353_v53 }
 0x2ad   : > { %379 = vst.msk [vmem:[#allocation2 + $0x18] sm:$0xff] %vm375_vm8, %v370_v54 }
 0x2ae   : > { %v387_v56 = vpop.permute.xlu0 %386  ;;  %v404_v57 = vpop.permute.xlu1 %403 }
 0x2af   : > { %396 = vst.msk [vmem:[#allocation2 + $0x18] sm:$0xff] %vm392_vm9, %v387_v56  ;;  %v591_v56 = vld [vmem:[#allocation6 + $0x58] sm:$0xff] }
 0x2b0   : > { %413 = vst.msk [vmem:[#allocation2 + $0x18] sm:$0xff] %vm409_vm10, %v404_v57  ;;  %v590_v57 = vld [vmem:[#allocation6 + $0x50] sm:$0xff] }
 0x2b2   : > { %v421_v58 = vpop.permute.xlu0 %420  ;;  %v334_v59 = vpop.permute.xlu1 %333 }
 0x2b3   : > { %430 = vst.msk [vmem:[#allocation2 + $0x18] sm:$0xff] %vm426_vm11, %v421_v58 }
 0x2b4   : > { %344 = vst.msk [vmem:[#allocation2 + $0x10] sm:$0xff] %vm3487_vm6, %v334_v59  ;;  %vm579_vm6 = vcmask 253168  }
 0x2b6   : > { %v438_v60 = vpop.permute.xlu0 %437  ;;  %v351_v61 = vpop.permute.xlu1 %350 }
 0x2b7   : > { %447 = vst.msk [vmem:[#allocation2 + $0x18] sm:$0xff] %vm443_vm12, %v438_v60 }
 0x2b8   : > { %361 = vst.msk [vmem:[#allocation2 + $0x10] sm:$0xff] %vm3486_vm7, %v351_v61  ;;  %vm562_vm7 = vcmask 236768  }
 0x2ba   : > { %v455_v62 = vpop.permute.xlu0 %454  ;;  %v534_v63 = vpop.permute.xlu1 %533 }
 0x2bb   : > { %464 = vst.msk [vmem:[#allocation2 + $0x18] sm:$0xff] %vm3488_vm13, %v455_v62 }
 0x2bc   : > { %546 = vst.msk [vmem:[#allocation2] sm:$0xff] %vm3489_vm3, %v534_v63 }
 0x2be   : > { %v472_v1 = vpop.permute.xlu0 %471  ;;  %v385_v2 = vpop.permute.xlu1 %384 }
 0x2bf   : > { %481 = vst.msk [vmem:[#allocation2 + $0x18] sm:$0xff] %vm477_vm14, %v472_v1 }
 0x2c2   : > { %v489_v3 = vpop.permute.xlu0 %488  ;;  %v402_v4 = vpop.permute.xlu1 %401 }
 0x2c3   : > { %498 = vst.msk [vmem:[#allocation2 + $0x18] sm:$0xff] %vm494_vm15, %v489_v3 }
 0x2c6   : > { %v506_v5 = vpop.permute.xlu0 %505  ;;  %v419_v6 = vpop.permute.xlu1 %418 }
 0x2c7   : > { %515 = vst.msk [vmem:[#allocation2 + $0x18] sm:$0xff] %vm511_vm2, %v506_v5 }
 0x2ca   : > { %v523_v7 = vpop.permute.xlu0 %522  ;;  %v436_v8 = vpop.permute.xlu1 %435 }
 0x2cb   : > { %532 = vst.msk [vmem:[#allocation2 + $0x18] sm:$0xff] %vm3490_vm4, %v523_v7  ;;  %v743_v7 = vld [vmem:[#allocation6 + $0x60] sm:$0xff] }
 0x2ce   : > { %v540_v9 = vpop.permute.xlu0 %539  ;;  %v453_v10 = vpop.permute.xlu1 %452 }
 0x2cf   : > { %549 = vst.msk [vmem:[#allocation2 + $0x18] sm:$0xff] %vm3489_vm3, %v540_v9 }
 0x2d2   : > { %v557_v11 = vpop.permute.xlu0 %556  ;;  %v470_v12 = vpop.permute.xlu1 %469 }
 0x2d3   : > { %566 = vst.msk [vmem:[#allocation2 + $0x18] sm:$0xff] %vm562_vm7, %v557_v11 }
 0x2d6   : > { %v574_v13 = vpop.permute.xlu0 %573  ;;  %v487_v14 = vpop.permute.xlu1 %486 }
 0x2d7   : > { %583 = vst.msk [vmem:[#allocation2 + $0x18] sm:$0xff] %vm579_vm6, %v574_v13 }
 0x2da   : > { %v368_v16 = vpop.permute.xlu0 %367  ;;  %v504_v17 = vpop.permute.xlu1 %503 }
 0x2db   : > { %378 = vst.msk [vmem:[#allocation2 + $0x10] sm:$0xff] %vm375_vm8, %v368_v16  ;;  %v744_v16 = vld [vmem:[#allocation6 + $0x70] sm:$0xff] }
 0x2dc   : > { %395 = vst.msk [vmem:[#allocation2 + $0x10] sm:$0xff] %vm392_vm9, %v385_v2 }
 0x2dd   : > { %412 = vst.msk [vmem:[#allocation2 + $0x10] sm:$0xff] %vm409_vm10, %v402_v4 }
 0x2de   : > { %429 = vst.msk [vmem:[#allocation2 + $0x10] sm:$0xff] %vm426_vm11, %v419_v6  ;;  %v553_v18 = vpop.permute.xlu0 %552  ;;  %v521_v19 = vpop.permute.xlu1 %520  ;;  %v587_v20 = vld [vmem:[#allocation2 + $0x18] sm:$0xff] }
 0x2df   : > { %446 = vst.msk [vmem:[#allocation2 + $0x10] sm:$0xff] %vm443_vm12, %v436_v8  ;;  %602 = vrot.lane.b32.xlu1 %v587_v20, %s2664_s24  ;;  %v971_v8 = vld [vmem:[#allocation6 + $0xa0] sm:$0xff] }
 0x2e0   : > { %564 = vst.msk [vmem:[#allocation2 + $0x8] sm:$0xff] %vm562_vm7, %v553_v18 }
 0x2e1   : > { %463 = vst.msk [vmem:[#allocation2 + $0x10] sm:$0xff] %vm3488_vm13, %v453_v10  ;;  %vm1179_vm13 = vcmask 515072  }
 0x2e2   : > { %480 = vst.msk [vmem:[#allocation2 + $0x10] sm:$0xff] %vm477_vm14, %v470_v12  ;;  %v570_v21 = vpop.permute.xlu0 %569  ;;  %v538_v22 = vpop.permute.xlu1 %537 }
 0x2e3   : > { %497 = vst.msk [vmem:[#allocation2 + $0x10] sm:$0xff] %vm494_vm15, %v487_v14 }
 0x2e4   : > { %514 = vst.msk [vmem:[#allocation2 + $0x10] sm:$0xff] %vm511_vm2, %v504_v17  ;;  %v972_v17 = vld [vmem:[#allocation6 + $0xb0] sm:$0xff] }
 0x2e5   : > { %581 = vst.msk [vmem:[#allocation2 + $0x8] sm:$0xff] %vm579_vm6, %v570_v21 }
 0x2e6   : > { %531 = vst.msk [vmem:[#allocation2 + $0x10] sm:$0xff] %vm3490_vm4, %v521_v19  ;;  %v572_v23 = vpop.permute.xlu0 %571  ;;  %v555_v24 = vpop.permute.xlu1 %554  ;;  %vm613_vm4 = vcmask 269312  }
 0x2e7   : > { %548 = vst.msk [vmem:[#allocation2 + $0x10] sm:$0xff] %vm3489_vm3, %v538_v22  ;;  %vm608_vm3 = vcmask 15360  }
 0x2e8   : > { %565 = vst.msk [vmem:[#allocation2 + $0x10] sm:$0xff] %vm562_vm7, %v555_v24 }
 0x2e9   : > { %582 = vst.msk [vmem:[#allocation2 + $0x10] sm:$0xff] %vm579_vm6, %v572_v23 }
 0x2ea   : > { %v568_v25 = vpop.permute.xlu0 %567  ;;  %v551_v26 = vpop.permute.xlu1 %550 }
 0x2eb   : > { %563 = vst.msk [vmem:[#allocation2] sm:$0xff] %vm562_vm7, %v551_v26 }
 0x2ec   : > { %v585_v27 = vld [vmem:[#allocation2 + $0x8] sm:$0xff]  ;;  %580 = vst.msk [vmem:[#allocation2] sm:$0xff] %vm579_vm6, %v568_v25 }
 0x2ed   : > { %1181 = vst.msk [vmem:[#allocation2 + $0x8] sm:$0xff] %vm1179_vm13, %v2663_v15  ;;  %598 = vrot.lane.b32.xlu1 %v585_v27, %s2664_s24 }
 0x2f0   : > { %v586_v28 = vld [vmem:[#allocation2 + $0x10] sm:$0xff] }
 0x2f1   : > { %600 = vrot.lane.b32.xlu0 %v586_v28, %s2664_s24 }
 0x2f3   : > { %v584_v29 = vld [vmem:[#allocation2] sm:$0xff] }
 0x2f4   : > { %1180 = vst.msk [vmem:[#allocation2] sm:$0xff] %vm1179_vm13, %v2663_v15  ;;  %vm771_vm13 = vcmask 400384  }
 0x2f5   : > { %596 = vrot.lane.b32.xlu0 %v584_v29, %s2664_s24  ;;  %2288 = vmatprep.mubr.msk.f32.mxu0 %vm771_vm13, %v743_v7 }
 0x351   : > { %v603_v30 = vpop.permute.xlu1 %602 }
 0x352   : > { %v612_v31 = vsel %vm608_vm3, 0.0, %v603_v30 }
 0x353   : > { %v617_v32 = vsel %vm613_vm4, %v612_v31, 0.0 }
 0x354   : > { %652 = vrot.lane.b32.xlu1 %v617_v32, %s2660_s19 }
 0x35f   : > { %v599_v33 = vpop.permute.xlu1 %598 }
 0x360   : > { %v610_v34 = vsel %vm608_vm3, 0.0, %v599_v33 }
 0x361   : > { %v615_v35 = vsel %vm613_vm4, %v610_v34, 0.0 }
 0x362   : > { %648 = vrot.lane.b32.xlu1 %v615_v35, %s2660_s19 }
 0x363   : > { %v601_v36 = vpop.permute.xlu0 %600 }
 0x364   : > { %v611_v37 = vsel %vm608_vm3, 0.0, %v601_v36 }
 0x365   : > { %v616_v38 = vsel %vm613_vm4, %v611_v37, 0.0 }
 0x366   : > { %640 = vrot.lane.b32.xlu1 %v617_v32, %s2661_s20  ;;  %650 = vrot.lane.b32.xlu0 %v616_v38, %s2660_s19 }
 0x367   : > { %v597_v39 = vpop.permute.xlu0 %596 }
 0x368   : > { %v609_v40 = vsel %vm608_vm3, 0.0, %v597_v39 }
 0x369   : > { %v614_v41 = vsel %vm613_vm4, %v609_v40, 0.0 }
 0x36a   : > { %636 = vrot.lane.b32.xlu1 %v615_v35, %s2661_s20  ;;  %646 = vrot.lane.b32.xlu0 %v614_v41, %s2660_s19 }
 0x36e   : > { %628 = vrot.lane.b32.xlu1 %v617_v32, %s2662_s23  ;;  %638 = vrot.lane.b32.xlu0 %v616_v38, %s2661_s20 }
 0x372   : > { %624 = vrot.lane.b32.xlu1 %v615_v35, %s2662_s23  ;;  %634 = vrot.lane.b32.xlu0 %v614_v41, %s2661_s20  ;;  %v859_v35 = vld [vmem:[#allocation6 + $0x80] sm:$0xff] }
 0x376   : > { %626 = vrot.lane.b32.xlu0 %v616_v38, %s2662_s23 }
 0x37a   : > { %622 = vrot.lane.b32.xlu0 %v614_v41, %s2662_s23 }
 0x3c6   : > { %v653_v43 = vpop.permute.xlu1 %652 }
 0x3c7   : > { %665 = vmatpush1.msra.mxu1 %v653_v43 }
 0x3c8   : > { %666 = vmatprep.subr.mxu1 %v2663_v15 }
 0x3d4   : > { %v649_v44 = vpop.permute.xlu1 %648 }
 0x3d8   : > { %v641_v45 = vpop.permute.xlu1 %640  ;;  %v651_v46 = vpop.permute.xlu0 %650 }
 0x3d9   : > { %667 = vmatpush1.msra.mxu1 %v651_v46 }
 0x3da   : > { %668 = vmatprep.subr.mxu1 %v2663_v15 }
 0x3db   : > { %669 = vmatpush1.msra.mxu1 %v649_v44 }
 0x3dc   : > { %670 = vmatprep.subr.mxu1 %v2663_v15  ;;  %v647_v47 = vpop.permute.xlu0 %646  ;;  %v637_v48 = vpop.permute.xlu1 %636 }
 0x3dd   : > { %671 = vmatpush1.msra.mxu1 %v647_v47 }
 0x3de   : > { %672 = vmatprep.subr.mxu1 %v2663_v15 }
 0x3df   : > { %673 = vmatpush1.msra.mxu1 %v641_v45 }
 0x3e0   : > { %674 = vmatprep.subr.mxu1 %v2663_v15  ;;  %v639_v49 = vpop.permute.xlu0 %638  ;;  %v629_v50 = vpop.permute.xlu1 %628 }
 0x3e1   : > { %675 = vmatpush1.msra.mxu1 %v639_v49 }
 0x3e2   : > { %676 = vmatprep.subr.mxu1 %v2663_v15 }
 0x3e3   : > { %677 = vmatpush1.msra.mxu1 %v637_v48 }
 0x3e4   : > { %678 = vmatprep.subr.mxu1 %v2663_v15  ;;  %v635_v51 = vpop.permute.xlu0 %634  ;;  %v625_v53 = vpop.permute.xlu1 %624 }
 0x3e5   : > { %679 = vmatpush1.msra.mxu1 %v635_v51  ;;  %v860_v51 = vld [vmem:[#allocation6 + $0x90] sm:$0xff] }
 0x3e6   : > { %680 = vmatprep.subr.mxu1 %v2663_v15 }
 0x3e7   : > { %681 = vmatpush1.msra.mxu1 %v629_v50 }
 0x3e8   : > { %682 = vmatprep.subr.mxu1 %v2663_v15  ;;  %v627_v52 = vpop.permute.xlu0 %626 }
 0x3e9   : > { %683 = vmatpush1.msra.mxu1 %v627_v52  ;;  %v1060_v52 = vld [vmem:[#allocation6 + $0xc0] sm:$0xff] }
 0x3ea   : > { %684 = vmatprep.subr.mxu1 %v2663_v15 }
 0x3eb   : > { %685 = vmatpush1.msra.mxu1 %v625_v53 }
 0x3ec   : > { %686 = vmatprep.subr.mxu1 %v2663_v15  ;;  %v623_v54 = vpop.permute.xlu0 %622 }
 0x3ed   : > { %687 = vmatpush1.msra.mxu1 %v623_v54 }
 0x3ee   : > { %688 = vmatprep.subr.mxu1 %v2663_v15 }
 0x3ef   : > { %2116 = vmatpush1.msk.msra.mxu1 %vm613_vm4, %v612_v31 }
 0x3f0   : > { %690 = vmatprep.subr.mxu1 %v2663_v15 }
 0x3f1   : > { %2117 = vmatpush1.msk.msra.mxu1 %vm613_vm4, %v611_v37 }
 0x3f2   : > { %692 = vmatprep.subr.mxu1 %v2663_v15 }
 0x3f3   : > { %2118 = vmatpush1.msk.msra.mxu1 %vm613_vm4, %v610_v34 }
 0x3f4   : > { %694 = vmatprep.subr.mxu1 %v2663_v15 }
 0x3f5   : > { %2119 = vmatpush1.msk.msra.mxu1 %vm613_vm4, %v609_v40 }
 0x3f6   : > { %726 = vmatprep.subr.mxu1 %v2663_v15 }
 0x3f7   : > { %2120 = vmatpush2.msk.msra.mxu1 %vm218_vm0, %v2655_v0 }
 0x3f8   : > { %729 = vmatmul.mubr.f32.vlgmr.msra.gmra.mxu1 %v588_v55  ;;  %2308 = vmatprep.subr.msk.mxu1 %vm218_vm0, %v2655_v0 }
 0x3f9   : > { %2122 = vmatprep.mubr.msk.f32.mxu1 %vm320_vm5, %v591_v56  ;;  %2309 = vmatpush3.msk.msra.mxu1 %vm218_vm0, %v2655_v0 }
 0x3fc   : > { %734 = vmatmul.mubr.f32.gmra.mxu1 %v590_v57  ;;  %v1061_v57 = vld [vmem:[#allocation6 + $0xd0] sm:$0xff] }
 0x3fd   : > { %2322 = vmatprep.mubr.msk.f32.mxu1 %vm771_vm13, %v971_v8 }
 0x4b8   : > { %v3108_v58 = vpop.f32.mrf.mxu1 }
 0x4b9   : > { %v739_v59 = vmul.f32 0.1, %v3108_v58 }
 0x4ba   : > { %v732_v60 = vpop.f32.mrf.mxu1 }
 0x4bb   : > { %v741_v61 = vmax.f32 %v3108_v58, %v739_v59 }
 0x4bc   : > { %v735_v62 = vpop.f32.mrf.mxu1 }
 0x4bd   : > { %v740_v63 = vmul.f32 0.1, %v735_v62  ;;  %747 = vrot.lane.b32.xlu0 %v741_v61, %s2665_s25 }
 0x4be   : > { %v737_v1 = vpop.f32.mrf.mxu1 }
 0x4bf   : > { %v742_v2 = vmax.f32 %v735_v62, %v740_v63 }
 0x4c1   : > { %749 = vrot.lane.b32.xlu1 %v742_v2, %s2665_s25 }
 0x52f   : > { %v748_v3 = vpop.permute.xlu0 %747 }
 0x530   : > { %v753_v4 = vsel %vm320_vm5, 0.0, %v748_v3 }
 0x531   : > { %v755_v5 = vsel %vm613_vm4, %v753_v4, 0.0 }
 0x532   : > { %765 = vrot.lane.b32.xlu0 %v755_v5, %s2661_s20 }
 0x533   : > { %v750_v6 = vpop.permute.xlu1 %749 }
 0x534   : > { %v754_v9 = vsel %vm320_vm5, 0.0, %v750_v6 }
 0x535   : > { %v756_v10 = vsel %vm613_vm4, %v754_v9, 0.0 }
 0x536   : > { %759 = vrot.lane.b32.xlu0 %v755_v5, %s2662_s23  ;;  %767 = vrot.lane.b32.xlu1 %v756_v10, %s2661_s20 }
 0x53a   : > { %761 = vrot.lane.b32.xlu1 %v756_v10, %s2662_s23 }
 0x5a4   : > { %v766_v11 = vpop.permute.xlu0 %765 }
 0x5a8   : > { %v768_v12 = vpop.permute.xlu1 %767  ;;  %v760_v14 = vpop.permute.xlu0 %759 }
 0x5a9   : > { %2276 = vmatprep.subr.mxu0 %v768_v12  ;;  %2310 = vmatprep.subr.mxu1 %v768_v12 }
 0x5aa   : > { %2277 = vmatpush3.msra.mxu0 %v768_v12  ;;  %2311 = vmatpush3.msra.mxu1 %v768_v12 }
 0x5ab   : > { %2278 = vmatprep.subr.mxu0 %v766_v11  ;;  %2312 = vmatprep.subr.mxu1 %v766_v11 }
 0x5ac   : > { %2279 = vmatpush3.msra.mxu0 %v766_v11  ;;  %2313 = vmatpush3.msra.mxu1 %v766_v11  ;;  %v762_v13 = vpop.permute.xlu1 %761 }
 0x5ad   : > { %2280 = vmatprep.subr.mxu0 %v762_v13  ;;  %2314 = vmatprep.subr.mxu1 %v762_v13 }
 0x5ae   : > { %2281 = vmatpush3.msra.mxu0 %v762_v13  ;;  %2315 = vmatpush3.msra.mxu1 %v762_v13 }
 0x5af   : > { %2282 = vmatprep.subr.mxu0 %v760_v14  ;;  %2316 = vmatprep.subr.mxu1 %v760_v14 }
 0x5b0   : > { %2283 = vmatpush3.msra.mxu0 %v760_v14  ;;  %2317 = vmatpush3.msra.mxu1 %v760_v14 }
 0x5b1   : > { %2284 = vmatprep.subr.msk.mxu0 %vm613_vm4, %v754_v9  ;;  %2318 = vmatprep.subr.msk.mxu1 %vm613_vm4, %v754_v9 }
 0x5b2   : > { %2285 = vmatpush3.msk.msra.mxu0 %vm613_vm4, %v754_v9  ;;  %2319 = vmatpush3.msk.msra.mxu1 %vm613_vm4, %v754_v9 }
 0x5b3   : > { %2286 = vmatprep.subr.msk.mxu0 %vm613_vm4, %v753_v4  ;;  %2320 = vmatprep.subr.msk.mxu1 %vm613_vm4, %v753_v4 }
 0x5b4   : > { %2287 = vmatpush3.msk.msra.mxu0 %vm613_vm4, %v753_v4  ;;  %2321 = vmatpush3.msk.msra.mxu1 %vm613_vm4, %v753_v4  ;;  %vm871_vm4 = vcmask 285696  }
 0x5b5   : > { %2289 = vmatmul.mubr.msk.f32.vlgmr.msra.gmra.mxu0 %vm771_vm13, %v744_v16  ;;  %2323 = vmatmul.mubr.msk.f32.vlgmr.msra.gmra.mxu1 %vm771_vm13, %v972_v17 }
 0x5b6   : > { %2291 = vmatprep.subr.msk.mxu0 %vm218_vm0, %v2655_v0  ;;  %2342 = vmatprep.subr.mxu1 %v2663_v15 }
 0x5b7   : > { %2292 = vmatpush3.msk.msra.mxu0 %vm218_vm0, %v2655_v0  ;;  %2343 = vmatpush3.msk.msra.mxu1 %vm218_vm0, %v2655_v0 }
 0x5b8   : > { %2344 = vmatprep.subr.mxu1 %v2663_v15  ;;  %2305 = vmatprep.mubr.msk.f32.mxu0 %vm771_vm13, %v859_v35 }
 0x675   : > { %v2290_v18 = vpop.f32.mrf.mxu0  ;;  %v2324_v19 = vpop.f32.mrf.mxu1 }
 0x676   : > { %v3142_v20 = vadd.f32 %v2290_v18, %v735_v62  ;;  %v3144_v21 = vadd.f32 %v2324_v19, %v735_v62 }
 0x677   : > { %v844_v22 = vpop.f32.mrf.mxu0  ;;  %v1045_v23 = vpop.f32.mrf.mxu1 }
 0x678   : > { %v856_v24 = vmul.f32 0.1, %v3142_v20  ;;  %v3148_v25 = vadd.f32 %v844_v22, %v3108_v58  ;;  %v3151_v26 = vadd.f32 %v1045_v23, %v3108_v58  ;;  %v1057_v27 = vmul.f32 0.1, %v3144_v21 }
 0x67a   : > { %v855_v28 = vmul.f32 0.1, %v3148_v25  ;;  %v858_v29 = vmax.f32 %v3142_v20, %v856_v24  ;;  %v1056_v30 = vmul.f32 0.1, %v3151_v26  ;;  %v1059_v32 = vmax.f32 %v3144_v21, %v1057_v27 }
 0x67c   : > { %865 = vrot.lane.b32.xlu1 %v858_v29, %s2656_s17  ;;  %v857_v31 = vmax.f32 %v3148_v25, %v855_v28  ;;  %v1058_v33 = vmax.f32 %v3151_v26, %v1056_v30 }
 0x67e   : > { %863 = vrot.lane.b32.xlu0 %v857_v31, %s2656_s17 }
 0x680   : > { %1066 = vrot.lane.b32.xlu1 %v1059_v32, %s2656_s17 }
 0x682   : > { %1064 = vrot.lane.b32.xlu0 %v1058_v33, %s2656_s17 }
 0x6ee   : > { %v866_v34 = vpop.permute.xlu1 %865 }
 0x6ef   : > { %v870_v36 = vsel %vm3493_vm1, 0.0, %v866_v34 }
 0x6f0   : > { %v864_v37 = vpop.permute.xlu0 %863  ;;  %v873_v38 = vsel %vm871_vm4, %v870_v36, 0.0 }
 0x6f1   : > { %v869_v39 = vsel %vm3493_vm1, 0.0, %v864_v37  ;;  %884 = vrot.lane.b32.xlu1 %v873_v38, %s3491_s8 }
 0x6f2   : > { %v1067_v40 = vpop.permute.xlu1 %1066  ;;  %v872_v41 = vsel %vm871_vm4, %v869_v39, 0.0 }
 0x6f3   : > { %882 = vrot.lane.b32.xlu0 %v872_v41, %s3491_s8  ;;  %v1071_v43 = vsel %vm3493_vm1, 0.0, %v1067_v40 }
 0x6f4   : > { %v1065_v42 = vpop.permute.xlu0 %1064  ;;  %v1073_v45 = vsel %vm871_vm4, %v1071_v43, 0.0 }
 0x6f5   : > { %878 = vrot.lane.b32.xlu1 %v873_v38, %s2660_s19  ;;  %v1070_v44 = vsel %vm3493_vm1, 0.0, %v1065_v42 }
 0x6f6   : > { %v1072_v46 = vsel %vm871_vm4, %v1070_v44, 0.0 }
 0x6f7   : > { %876 = vrot.lane.b32.xlu0 %v872_v41, %s2660_s19 }
 0x6f9   : > { %1084 = vrot.lane.b32.xlu1 %v1073_v45, %s3491_s8 }
 0x6fb   : > { %1082 = vrot.lane.b32.xlu0 %v1072_v46, %s3491_s8  ;;  %s3505_s8 = smov 6  }
 0x6fd   : > { %1078 = vrot.lane.b32.xlu1 %v1073_v45, %s2660_s19 }
 0x6ff   : > { %1076 = vrot.lane.b32.xlu0 %v1072_v46, %s2660_s19 }
 0x763   : > { %v885_v47 = vpop.permute.xlu1 %884 }
 0x764   : > { %2293 = vmatprep.subr.mxu0 %v885_v47 }
 0x765   : > { %2294 = vmatpush3.msra.mxu0 %v885_v47  ;;  %v883_v48 = vpop.permute.xlu0 %882 }
 0x766   : > { %2295 = vmatprep.subr.mxu0 %v883_v48 }
 0x767   : > { %v879_v49 = vpop.permute.xlu1 %878  ;;  %2296 = vmatpush3.msra.mxu0 %v883_v48 }
 0x768   : > { %2297 = vmatprep.subr.mxu0 %v879_v49 }
 0x769   : > { %2298 = vmatpush3.msra.mxu0 %v879_v49  ;;  %v877_v50 = vpop.permute.xlu0 %876 }
 0x76a   : > { %2299 = vmatprep.subr.mxu0 %v877_v50 }
 0x76b   : > { %2300 = vmatpush3.msra.mxu0 %v877_v50  ;;  %v1085_v53 = vpop.permute.xlu1 %1084 }
 0x76c   : > { %2301 = vmatprep.subr.msk.mxu0 %vm871_vm4, %v870_v36 }
 0x76d   : > { %2302 = vmatpush3.msk.msra.mxu0 %vm871_vm4, %v870_v36  ;;  %v1083_v54 = vpop.permute.xlu0 %1082 }
 0x76e   : > { %2303 = vmatprep.subr.msk.mxu0 %vm871_vm4, %v869_v39 }
 0x76f   : > { %2304 = vmatpush3.msk.msra.mxu0 %vm871_vm4, %v869_v39  ;;  %v1079_v55 = vpop.permute.xlu1 %1078 }
 0x770   : > { %2306 = vmatmul.mubr.msk.f32.vlgmr.msra.gmra.mxu0 %vm771_vm13, %v860_v51  ;;  %2325 = vmatprep.subr.msk.mxu0 %vm218_vm0, %v2655_v0 }
 0x771   : > { %2326 = vmatpush3.msk.msra.mxu0 %vm218_vm0, %v2655_v0  ;;  %2339 = vmatprep.mubr.msk.f32.mxu0 %vm771_vm13, %v1060_v52  ;;  %v1077_v56 = vpop.permute.xlu0 %1076 }
 0x772   : > { %2327 = vmatprep.subr.mxu0 %v1085_v53 }
 0x773   : > { %2328 = vmatpush3.msra.mxu0 %v1085_v53 }
 0x774   : > { %2329 = vmatprep.subr.mxu0 %v1083_v54 }
 0x775   : > { %2330 = vmatpush3.msra.mxu0 %v1083_v54 }
 0x776   : > { %2331 = vmatprep.subr.mxu0 %v1079_v55 }
 0x777   : > { %2332 = vmatpush3.msra.mxu0 %v1079_v55 }
 0x778   : > { %2333 = vmatprep.subr.mxu0 %v1077_v56 }
 0x779   : > { %2334 = vmatpush3.msra.mxu0 %v1077_v56 }
 0x77a   : > { %2335 = vmatprep.subr.msk.mxu0 %vm871_vm4, %v1071_v43 }
 0x77b   : > { %2336 = vmatpush3.msk.msra.mxu0 %vm871_vm4, %v1071_v43 }
 0x77c   : > { %2337 = vmatprep.subr.msk.mxu0 %vm871_vm4, %v1070_v44 }
 0x77d   : > { %2338 = vmatpush3.msk.msra.mxu0 %vm871_vm4, %v1070_v44  ;;  %vm3507_vm4 = vcmask 39968  }
 0x77e   : > { %2340 = vmatmul.mubr.msk.f32.vlgmr.msra.gmra.mxu0 %vm771_vm13, %v1061_v57  ;;  %2363 = vmatprep.subr.mxu0 %v2663_v15  ;;  %vm3506_vm13 = vcmask 23568  }
 0x77f   : > { %2364 = vmatpush3.msk.msra.mxu0 %vm218_vm0, %v2655_v0  ;;  %vm3508_vm1 = vmmov %vm3506_vm13 }
 0x780   : > { %2365 = vmatprep.subr.mxu0 %v2663_v15 }
 0x830   : > { %v2307_v58 = vpop.f32.mrf.mxu0 }
 0x831   : > { %v970_v61 = vadd.f32 %v2307_v58, %v3142_v20 }
 0x832   : > { %v960_v59 = vpop.f32.mrf.mxu0 }
 0x833   : > { %v969_v1 = vadd.f32 %v960_v59, %v3148_v25 }
 0x83e   : > { %v2341_v60 = vpop.f32.mrf.mxu0 }
 0x83f   : > { %v1170_v62 = vadd.f32 %v2341_v60, %v3144_v21 }
 0x840   : > { %v1160_v63 = vpop.f32.mrf.mxu0 }
 0x841   : > { %v1172_v2 = vadd.f32 %v1170_v62, %v970_v61  ;;  %v1169_v3 = vadd.f32 %v1160_v63, %v3151_v26 }
 0x843   : > { %v1174_v4 = vmul.f32 0.5, %v1172_v2  ;;  %v1171_v5 = vadd.f32 %v1169_v3, %v969_v1 }
 0x845   : > { %v1176_v6 = vmul.f32 0.1, %v1174_v4  ;;  %v1173_v7 = vmul.f32 0.5, %v1171_v5 }
 0x847   : > { %v3204_v8 = vmax.f32 %v1174_v4, %v1176_v6  ;;  %v1175_v9 = vmul.f32 0.1, %v1173_v7 }
 0x849   : > { %1183 = vst.msk [vmem:[#allocation2 + $0x8] sm:$0xff] %vm320_vm5, %v3204_v8  ;;  %v3208_v10 = vmax.f32 %v1173_v7, %v1175_v9  ;;  %1196 = vrot.lane.b32.xlu0 %v3204_v8, %s2664_s24  ;;  %1188 = vrot.lane.b32.xlu1 %v3204_v8, %s2665_s25 }
 0x84b   : > { %1182 = vst.msk [vmem:[#allocation2] sm:$0xff] %vm320_vm5, %v3208_v10 }
 0x84d   : > { %1204 = vrot.lane.b32.xlu0 %v3204_v8, %s2656_s17  ;;  %1186 = vrot.lane.b32.xlu1 %v3208_v10, %s2665_s25 }
 0x851   : > { %1212 = vrot.lane.b32.xlu0 %v3204_v8, %s2667_s27  ;;  %1194 = vrot.lane.b32.xlu1 %v3208_v10, %s2664_s24 }
 0x855   : > { %1220 = vrot.lane.b32.xlu0 %v3204_v8, %s2668_s28  ;;  %1202 = vrot.lane.b32.xlu1 %v3208_v10, %s2656_s17 }
 0x859   : > { %1228 = vrot.lane.b32.xlu0 %v3204_v8, %s3505_s8  ;;  %1210 = vrot.lane.b32.xlu1 %v3208_v10, %s2667_s27  ;;  %s2679_s27 = smov 17  }
 0x85d   : > { %1236 = vrot.lane.b32.xlu0 %v3204_v8, %s2670_s4  ;;  %1218 = vrot.lane.b32.xlu1 %v3208_v10, %s2668_s28  ;;  %s2680_s28 = smov 18  }
 0x861   : > { %1244 = vrot.lane.b32.xlu0 %v3204_v8, %s2671_s5  ;;  %1226 = vrot.lane.b32.xlu1 %v3208_v10, %s3505_s8  ;;  %s2678_s8 = smov 16  }
 0x865   : > { %1252 = vrot.lane.b32.xlu0 %v3204_v8, %s2672_s7  ;;  %1234 = vrot.lane.b32.xlu1 %v3208_v10, %s2670_s4  ;;  %s2685_s4 = smov 23  }
 0x869   : > { %1260 = vrot.lane.b32.xlu0 %v3204_v8, %s2673_s14  ;;  %1242 = vrot.lane.b32.xlu1 %v3208_v10, %s2671_s5  ;;  %s2686_s5 = smov 24  }
 0x86d   : > { %1268 = vrot.lane.b32.xlu0 %v3204_v8, %s2674_s22  ;;  %1250 = vrot.lane.b32.xlu1 %v3208_v10, %s2672_s7  ;;  %s2687_s7 = smov 25  }
 0x871   : > { %1276 = vrot.lane.b32.xlu0 %v3204_v8, %s2675_s18  ;;  %1258 = vrot.lane.b32.xlu1 %v3208_v10, %s2673_s14  ;;  %s2688_s14 = smov 26  }
 0x875   : > { %1284 = vrot.lane.b32.xlu0 %v3204_v8, %s2666_s26  ;;  %1266 = vrot.lane.b32.xlu1 %v3208_v10, %s2674_s22  ;;  %s2689_s22 = smov 27  }
 0x879   : > { %1292 = vrot.lane.b32.xlu0 %v3204_v8, %s2676_s15  ;;  %1274 = vrot.lane.b32.xlu1 %v3208_v10, %s2675_s18  ;;  %s2681_s18 = smov 19  }
 0x87d   : > { %1300 = vrot.lane.b32.xlu0 %v3204_v8, %s2677_s3  ;;  %1282 = vrot.lane.b32.xlu1 %v3208_v10, %s2666_s26  ;;  %s2682_s26 = smov 20  }
 0x881   : > { %1308 = vrot.lane.b32.xlu0 %v3204_v8, %s2678_s8  ;;  %1290 = vrot.lane.b32.xlu1 %v3208_v10, %s2676_s15  ;;  %s2683_s15 = smov 21  }
 0x885   : > { %1317 = vrot.lane.b32.xlu0 %v3204_v8, %s2679_s27  ;;  %1298 = vrot.lane.b32.xlu1 %v3208_v10, %s2677_s3  ;;  %s2684_s3 = smov 22  }
 0x889   : > { %1326 = vrot.lane.b32.xlu0 %v3204_v8, %s2680_s28  ;;  %1306 = vrot.lane.b32.xlu1 %v3208_v10, %s2678_s8  ;;  %s2690_s8 = smov 28  }
 0x88d   : > { %1335 = vrot.lane.b32.xlu0 %v3204_v8, %s2681_s18  ;;  %1315 = vrot.lane.b32.xlu1 %v3208_v10, %s2679_s27  ;;  %s2691_s27 = smov 29  }
 0x891   : > { %1344 = vrot.lane.b32.xlu0 %v3204_v8, %s2682_s26  ;;  %1324 = vrot.lane.b32.xlu1 %v3208_v10, %s2680_s28  ;;  %s2692_s28 = smov 30  }
 0x895   : > { %1353 = vrot.lane.b32.xlu0 %v3204_v8, %s2683_s15  ;;  %1333 = vrot.lane.b32.xlu1 %v3208_v10, %s2681_s18  ;;  %s2693_s18 = smov 31  }
 0x899   : > { %1362 = vrot.lane.b32.xlu0 %v3204_v8, %s2684_s3  ;;  %1342 = vrot.lane.b32.xlu1 %v3208_v10, %s2682_s26  ;;  %s3521_s26 = smov 124  }
 0x89d   : > { %1371 = vrot.lane.b32.xlu0 %v3204_v8, %s2685_s4  ;;  %1351 = vrot.lane.b32.xlu1 %v3208_v10, %s2683_s15 }
 0x8a1   : > { %1380 = vrot.lane.b32.xlu0 %v3204_v8, %s2686_s5  ;;  %1360 = vrot.lane.b32.xlu1 %v3208_v10, %s2684_s3 }
 0x8a5   : > { %1389 = vrot.lane.b32.xlu0 %v3204_v8, %s2687_s7  ;;  %1369 = vrot.lane.b32.xlu1 %v3208_v10, %s2685_s4  ;;  %s2013_s4 = scalar_lea.sflag [#allocation5], %s2818_s6 }
 0x8a9   : > { %1398 = vrot.lane.b32.xlu0 %v3204_v8, %s2688_s14  ;;  %1378 = vrot.lane.b32.xlu1 %v3208_v10, %s2686_s5 }
 0x8ad   : > { %1407 = vrot.lane.b32.xlu0 %v3204_v8, %s2689_s22  ;;  %1387 = vrot.lane.b32.xlu1 %v3208_v10, %s2687_s7  ;;  %s2695_s7 = smov [#allocation8]  }
 0x8b1   : > { %1416 = vrot.lane.b32.xlu0 %v3204_v8, %s2690_s8  ;;  %1396 = vrot.lane.b32.xlu1 %v3208_v10, %s2688_s14  ;;  %s2585_s14 = sshll.u32 %s2695_s7, 4  ;;  %s2586_s14 = int_to_ptr.vmem [resolvable:$false] %s2585_s14 }
 0x8b5   : > { %1425 = vrot.lane.b32.xlu0 %v3204_v8, %s2691_s27  ;;  %1405 = vrot.lane.b32.xlu1 %v3208_v10, %s2689_s22 }
 0x8b9   : > { %1434 = vrot.lane.b32.xlu0 %v3204_v8, %s2692_s28  ;;  %1414 = vrot.lane.b32.xlu1 %v3208_v10, %s2690_s8 }
 0x8bb   : > { %v1197_v11 = vpop.permute.xlu0 %1196  ;;  %v1189_v12 = vpop.permute.xlu1 %1188 }
 0x8bc   : > { %1193 = vst.msk [vmem:[#allocation2 + $0x8] sm:$0xff] %vm3506_vm13, %v1189_v12  ;;  %vm3509_vm13 = vmmov %vm3507_vm4 }
 0x8bd   : > { %1201 = vst.msk [vmem:[#allocation2 + $0x8] sm:$0xff] %vm3507_vm4, %v1197_v11  ;;  %1443 = vrot.lane.b32.xlu0 %v3204_v8, %s2693_s18  ;;  %1423 = vrot.lane.b32.xlu1 %v3208_v10, %s2691_s27  ;;  %vm1339_vm4 = vcmask 318768  }
 0x8bf   : > { %v1205_v13 = vpop.permute.xlu0 %1204  ;;  %v1187_v14 = vpop.permute.xlu1 %1186 }
 0x8c0   : > { %1209 = vst.msk [vmem:[#allocation2 + $0x8] sm:$0xff] %vm375_vm8, %v1205_v13 }
 0x8c1   : > { %1192 = vst.msk [vmem:[#allocation2] sm:$0xff] %vm3508_vm1, %v1187_v14  ;;  %1441 = vrot.lane.b32.xlu0 %v3208_v10, %s2693_s18  ;;  %1432 = vrot.lane.b32.xlu1 %v3208_v10, %s2692_s28  ;;  %vm3510_vm1 = vcmask 138368  }
 0x8c3   : > { %v1213_v16 = vpop.permute.xlu0 %1212  ;;  %v1195_v17 = vpop.permute.xlu1 %1194 }
 0x8c4   : > { %1217 = vst.msk [vmem:[#allocation2 + $0x8] sm:$0xff] %vm392_vm9, %v1213_v16 }
 0x8c5   : > { %1200 = vst.msk [vmem:[#allocation2] sm:$0xff] %vm3509_vm13, %v1195_v17  ;;  %vm1348_vm13 = vcmask 335168  }
 0x8c7   : > { %v1221_v18 = vpop.permute.xlu0 %1220  ;;  %v1203_v19 = vpop.permute.xlu1 %1202 }
 0x8c8   : > { %1225 = vst.msk [vmem:[#allocation2 + $0x8] sm:$0xff] %vm409_vm10, %v1221_v18 }
 0x8c9   : > { %1208 = vst.msk [vmem:[#allocation2] sm:$0xff] %vm375_vm8, %v1203_v19  ;;  %vm3511_vm8 = vmmov %vm3510_vm1 }
 0x8cb   : > { %v1229_v20 = vpop.permute.xlu0 %1228  ;;  %v1211_v21 = vpop.permute.xlu1 %1210 }
 0x8cc   : > { %1233 = vst.msk [vmem:[#allocation2 + $0x8] sm:$0xff] %vm426_vm11, %v1229_v20 }
 0x8cd   : > { %1216 = vst.msk [vmem:[#allocation2] sm:$0xff] %vm392_vm9, %v1211_v21  ;;  %vm3512_vm9 = vcmask 203968  }
 0x8cf   : > { %v1237_v22 = vpop.permute.xlu0 %1236  ;;  %v1219_v23 = vpop.permute.xlu1 %1218 }
 0x8d0   : > { %1241 = vst.msk [vmem:[#allocation2 + $0x8] sm:$0xff] %vm443_vm12, %v1237_v22 }
 0x8d1   : > { %1224 = vst.msk [vmem:[#allocation2] sm:$0xff] %vm409_vm10, %v1219_v23  ;;  %vm3513_vm10 = vcmask 220368  }
 0x8d3   : > { %v1245_v24 = vpop.permute.xlu0 %1244  ;;  %v1227_v25 = vpop.permute.xlu1 %1226 }
 0x8d4   : > { %1249 = vst.msk [vmem:[#allocation2 + $0x8] sm:$0xff] %vm3510_vm1, %v1245_v24  ;;  %vm1375_vm1 = vcmask 384368  }
 0x8d5   : > { %1232 = vst.msk [vmem:[#allocation2] sm:$0xff] %vm426_vm11, %v1227_v25  ;;  %vm3514_vm11 = vmmov %vm3512_vm9 }
 0x8d7   : > { %v1253_v26 = vpop.permute.xlu0 %1252  ;;  %v1235_v27 = vpop.permute.xlu1 %1234 }
 0x8d8   : > { %1257 = vst.msk [vmem:[#allocation2 + $0x8] sm:$0xff] %vm477_vm14, %v1253_v26  ;;  %v1452_v26 = vld [vmem:[#allocation6 + $0xe0] sm:$0xff] }
 0x8d9   : > { %1240 = vst.msk [vmem:[#allocation2] sm:$0xff] %vm443_vm12, %v1235_v27  ;;  %vm3515_vm12 = vmmov %vm3513_vm10 }
 0x8db   : > { %v1261_v28 = vpop.permute.xlu0 %1260  ;;  %v1243_v29 = vpop.permute.xlu1 %1242 }
 0x8dc   : > { %1265 = vst.msk [vmem:[#allocation2 + $0x8] sm:$0xff] %vm494_vm15, %v1261_v28 }
 0x8dd   : > { %1248 = vst.msk [vmem:[#allocation2] sm:$0xff] %vm3511_vm8, %v1243_v29  ;;  %vm1384_vm8 = vcmask 400768  }
 0x8df   : > { %v1269_v30 = vpop.permute.xlu0 %1268  ;;  %v1251_v31 = vpop.permute.xlu1 %1250 }
 0x8e0   : > { %1273 = vst.msk [vmem:[#allocation2 + $0x8] sm:$0xff] %vm511_vm2, %v1269_v30 }
 0x8e1   : > { %1256 = vst.msk [vmem:[#allocation2] sm:$0xff] %vm477_vm14, %v1251_v31  ;;  %vm1312_vm14 = vcmask 269568  }
 0x8e3   : > { %v1277_v32 = vpop.permute.xlu0 %1276  ;;  %v1259_v33 = vpop.permute.xlu1 %1258 }
 0x8e4   : > { %1281 = vst.msk [vmem:[#allocation2 + $0x8] sm:$0xff] %vm3512_vm9, %v1277_v32  ;;  %vm1393_vm9 = vcmask 417168  }
 0x8e5   : > { %1264 = vst.msk [vmem:[#allocation2] sm:$0xff] %vm494_vm15, %v1259_v33  ;;  %vm1321_vm15 = vcmask 285968  }
 0x8e7   : > { %v1285_v34 = vpop.permute.xlu0 %1284  ;;  %v1267_v35 = vpop.permute.xlu1 %1266 }
 0x8e8   : > { %1289 = vst.msk [vmem:[#allocation2 + $0x8] sm:$0xff] %vm3513_vm10, %v1285_v34  ;;  %vm1402_vm10 = vcmask 433568  }
 0x8e9   : > { %1272 = vst.msk [vmem:[#allocation2] sm:$0xff] %vm511_vm2, %v1267_v35  ;;  %vm1330_vm2 = vcmask 302368  }
 0x8eb   : > { %v1293_v36 = vpop.permute.xlu0 %1292  ;;  %v1275_v37 = vpop.permute.xlu1 %1274 }
 0x8ec   : > { %1297 = vst.msk [vmem:[#allocation2 + $0x8] sm:$0xff] %vm562_vm7, %v1293_v36  ;;  %v1561_v36 = vld [vmem:[#allocation6 + $0xf0] sm:$0xff] }
 0x8ed   : > { %1280 = vst.msk [vmem:[#allocation2] sm:$0xff] %vm3514_vm11, %v1275_v37  ;;  %vm1411_vm11 = vcmask 449968   ;;  %v1741_v37 = vld [vmem:[#allocation6 + $0x110] sm:$0xff] }
 0x8ef   : > { %v1301_v38 = vpop.permute.xlu0 %1300  ;;  %v1283_v39 = vpop.permute.xlu1 %1282 }
 0x8f0   : > { %1305 = vst.msk [vmem:[#allocation2 + $0x8] sm:$0xff] %vm579_vm6, %v1301_v38 }
 0x8f1   : > { %1288 = vst.msk [vmem:[#allocation2] sm:$0xff] %vm3515_vm12, %v1283_v39  ;;  %vm1420_vm12 = vcmask 466368  }
 0x8f3   : > { %v1309_v40 = vpop.permute.xlu0 %1308  ;;  %v1291_v41 = vpop.permute.xlu1 %1290 }
 0x8f4   : > { %1314 = vst.msk [vmem:[#allocation2 + $0x8] sm:$0xff] %vm1312_vm14, %v1309_v40 }
 0x8f5   : > { %1296 = vst.msk [vmem:[#allocation2] sm:$0xff] %vm562_vm7, %v1291_v41  ;;  %vm1357_vm7 = vcmask 351568  }
 0x8f7   : > { %v1318_v42 = vpop.permute.xlu0 %1317  ;;  %v1299_v43 = vpop.permute.xlu1 %1298 }
 0x8f8   : > { %1323 = vst.msk [vmem:[#allocation2 + $0x8] sm:$0xff] %vm1321_vm15, %v1318_v42 }
 0x8f9   : > { %1304 = vst.msk [vmem:[#allocation2] sm:$0xff] %vm579_vm6, %v1299_v43  ;;  %vm1366_vm6 = vcmask 367968  }
 0x8fb   : > { %v1327_v44 = vpop.permute.xlu0 %1326  ;;  %v1307_v45 = vpop.permute.xlu1 %1306 }
 0x8fc   : > { %1332 = vst.msk [vmem:[#allocation2 + $0x8] sm:$0xff] %vm1330_vm2, %v1327_v44 }
 0x8fd   : > { %1313 = vst.msk [vmem:[#allocation2] sm:$0xff] %vm1312_vm14, %v1307_v45  ;;  %vm1429_vm14 = vcmask 482768  }
 0x8ff   : > { %v1336_v46 = vpop.permute.xlu0 %1335  ;;  %v1316_v47 = vpop.permute.xlu1 %1315 }
 0x900   : > { %1341 = vst.msk [vmem:[#allocation2 + $0x8] sm:$0xff] %vm1339_vm4, %v1336_v46 }
 0x901   : > { %1322 = vst.msk [vmem:[#allocation2] sm:$0xff] %vm1321_vm15, %v1316_v47  ;;  %vm1438_vm15 = vcmask 499168  }
 0x903   : > { %v1345_v48 = vpop.permute.xlu0 %1344  ;;  %v1325_v49 = vpop.permute.xlu1 %1324 }
 0x904   : > { %1350 = vst.msk [vmem:[#allocation2 + $0x8] sm:$0xff] %vm1348_vm13, %v1345_v48 }
 0x905   : > { %1331 = vst.msk [vmem:[#allocation2] sm:$0xff] %vm1330_vm2, %v1325_v49  ;;  %vm1447_vm2 = vcmask 515568  }
 0x907   : > { %v1354_v50 = vpop.permute.xlu0 %1353  ;;  %v1334_v51 = vpop.permute.xlu1 %1333 }
 0x908   : > { %1359 = vst.msk [vmem:[#allocation2 + $0x8] sm:$0xff] %vm1357_vm7, %v1354_v50 }
 0x909   : > { %1340 = vst.msk [vmem:[#allocation2] sm:$0xff] %vm1339_vm4, %v1334_v51  ;;  %vm1463_vm4 = vcmask 531456  }
 0x90b   : > { %v1363_v52 = vpop.permute.xlu0 %1362  ;;  %v1343_v53 = vpop.permute.xlu1 %1342 }
 0x90c   : > { %1368 = vst.msk [vmem:[#allocation2 + $0x8] sm:$0xff] %vm1366_vm6, %v1363_v52 }
 0x90d   : > { %1349 = vst.msk [vmem:[#allocation2] sm:$0xff] %vm1348_vm13, %v1343_v53  ;;  %vm2694_vm13 = vmmov 0  }
 0x90e   : > { %2360 = vmatprep.mubr.msk.f32.mxu1 %vm2694_vm13, %v2663_v15  ;;  %2371 = vmatprep.mubr.msk.f32.mxu0 %vm2694_vm13, %v2663_v15 }
 0x90f   : > { %v1372_v54 = vpop.permute.xlu0 %1371  ;;  %v1352_v55 = vpop.permute.xlu1 %1351 }
 0x910   : > { %1377 = vst.msk [vmem:[#allocation2 + $0x8] sm:$0xff] %vm1375_vm1, %v1372_v54 }
 0x911   : > { %1358 = vst.msk [vmem:[#allocation2] sm:$0xff] %vm1357_vm7, %v1352_v55  ;;  %vm3516_vm7 = vcmask 23552  }
 0x913   : > { %v1381_v56 = vpop.permute.xlu0 %1380  ;;  %v1361_v57 = vpop.permute.xlu1 %1360 }
 0x914   : > { %1386 = vst.msk [vmem:[#allocation2 + $0x8] sm:$0xff] %vm1384_vm8, %v1381_v56  ;;  %v1652_v56 = vld [vmem:[#allocation6 + $0x100] sm:$0xff] }
 0x915   : > { %1367 = vst.msk [vmem:[#allocation2] sm:$0xff] %vm1366_vm6, %v1361_v57  ;;  %vm3517_vm6 = vmmov %vm3516_vm7 }
 0x917   : > { %v1390_v58 = vpop.permute.xlu0 %1389  ;;  %v1370_v59 = vpop.permute.xlu1 %1369 }
 0x918   : > { %1395 = vst.msk [vmem:[#allocation2 + $0x8] sm:$0xff] %vm1393_vm9, %v1390_v58 }
 0x919   : > { %1376 = vst.msk [vmem:[#allocation2] sm:$0xff] %vm1375_vm1, %v1370_v59  ;;  %v1818_v59 = vld [vmem:[#allocation6 + $0x120] sm:$0xff]  ;;  %vm3522_vm1 = vcmask 465920  }
 0x91b   : > { %v1399_v60 = vpop.permute.xlu0 %1398  ;;  %v1379_v61 = vpop.permute.xlu1 %1378 }
 0x91c   : > { %1404 = vst.msk [vmem:[#allocation2 + $0x8] sm:$0xff] %vm1402_vm10, %v1399_v60 }
 0x91d   : > { %1385 = vst.msk [vmem:[#allocation2] sm:$0xff] %vm1384_vm8, %v1379_v61  ;;  %vm2010_vm8 = vcmask 516096  }
 0x91f   : > { %v1408_v62 = vpop.permute.xlu0 %1407  ;;  %v1388_v63 = vpop.permute.xlu1 %1387 }
 0x920   : > { %1413 = vst.msk [vmem:[#allocation2 + $0x8] sm:$0xff] %vm1411_vm11, %v1408_v62 }
 0x921   : > { %1394 = vst.msk [vmem:[#allocation2] sm:$0xff] %vm1393_vm9, %v1388_v63 }
 0x923   : > { %v1417_v1 = vpop.permute.xlu0 %1416  ;;  %v1397_v2 = vpop.permute.xlu1 %1396 }
 0x924   : > { %1422 = vst.msk [vmem:[#allocation2 + $0x8] sm:$0xff] %vm1420_vm12, %v1417_v1 }
 0x925   : > { %1403 = vst.msk [vmem:[#allocation2] sm:$0xff] %vm1402_vm10, %v1397_v2 }
 0x927   : > { %v1426_v3 = vpop.permute.xlu0 %1425  ;;  %v1406_v4 = vpop.permute.xlu1 %1405 }
 0x928   : > { %1431 = vst.msk [vmem:[#allocation2 + $0x8] sm:$0xff] %vm1429_vm14, %v1426_v3 }
 0x929   : > { %1412 = vst.msk [vmem:[#allocation2] sm:$0xff] %vm1411_vm11, %v1406_v4 }
 0x92b   : > { %v1435_v5 = vpop.permute.xlu0 %1434  ;;  %v1415_v6 = vpop.permute.xlu1 %1414 }
 0x92c   : > { %1440 = vst.msk [vmem:[#allocation2 + $0x8] sm:$0xff] %vm1438_vm15, %v1435_v5 }
 0x92d   : > { %1421 = vst.msk [vmem:[#allocation2] sm:$0xff] %vm1420_vm12, %v1415_v6 }
 0x92f   : > { %v1444_v7 = vpop.permute.xlu0 %1443  ;;  %v1424_v8 = vpop.permute.xlu1 %1423 }
 0x930   : > { %1449 = vst.msk [vmem:[#allocation2 + $0x8] sm:$0xff] %vm1447_vm2, %v1444_v7 }
 0x931   : > { %1430 = vst.msk [vmem:[#allocation2] sm:$0xff] %vm1429_vm14, %v1424_v8 }
 0x933   : > { %v1442_v9 = vpop.permute.xlu0 %1441  ;;  %v1433_v10 = vpop.permute.xlu1 %1432 }
 0x934   : > { %1439 = vst.msk [vmem:[#allocation2] sm:$0xff] %vm1438_vm15, %v1433_v10 }
 0x935   : > { %1448 = vst.msk [vmem:[#allocation2] sm:$0xff] %vm1447_vm2, %v1442_v9 }
 0x937   : > { %v1451_v11 = vld [vmem:[#allocation2 + $0x8] sm:$0xff] }
 0x938   : > { %1457 = vrot.lane.b32.xlu1 %v1451_v11, %s2664_s24 }
 0x93c   : > { %v1450_v12 = vld [vmem:[#allocation2] sm:$0xff] }
 0x93d   : > { %1455 = vrot.lane.b32.xlu0 %v1450_v12, %s2664_s24  ;;  %s3518_s24 = smov 122  }
 0x9aa   : > { %v1458_v13 = vpop.permute.xlu1 %1457 }
 0x9ab   : > { %v1462_v14 = vsel %vm608_vm3, 0.0, %v1458_v13 }
 0x9ac   : > { %v1465_v16 = vsel %vm1463_vm4, %v1462_v14, 0.0 }
 0x9ad   : > { %1482 = vrot.lane.b32.xlu1 %v1465_v16, %s2660_s19 }
 0x9af   : > { %v1456_v17 = vpop.permute.xlu0 %1455 }
 0x9b0   : > { %v1461_v18 = vsel %vm608_vm3, 0.0, %v1456_v17  ;;  %vm1575_vm3 = vcmask 203776  }
 0x9b1   : > { %v1464_v19 = vsel %vm1463_vm4, %v1461_v18, 0.0  ;;  %1476 = vrot.lane.b32.xlu1 %v1465_v16, %s2661_s20 }
 0x9b2   : > { %1480 = vrot.lane.b32.xlu0 %v1464_v19, %s2660_s19 }
 0x9b5   : > { %1470 = vrot.lane.b32.xlu1 %v1465_v16, %s2662_s23  ;;  %v1910_v16 = vld [vmem:[#allocation6 + $0x130] sm:$0xff] }
 0x9b6   : > { %1474 = vrot.lane.b32.xlu0 %v1464_v19, %s2661_s20 }
 0x9ba   : > { %1468 = vrot.lane.b32.xlu0 %v1464_v19, %s2662_s23 }
 0xa1f   : > { %v1483_v20 = vpop.permute.xlu1 %1482 }
 0xa20   : > { %2345 = vmatpush3.msra.mxu1 %v1483_v20 }
 0xa21   : > { %2346 = vmatprep.subr.mxu1 %v2663_v15 }
 0xa23   : > { %v1477_v21 = vpop.permute.xlu1 %1476 }
 0xa24   : > { %v1481_v22 = vpop.permute.xlu0 %1480 }
 0xa25   : > { %2347 = vmatpush3.msra.mxu1 %v1481_v22 }
 0xa26   : > { %2348 = vmatprep.subr.mxu1 %v2663_v15 }
 0xa27   : > { %2349 = vmatpush3.msra.mxu1 %v1477_v21  ;;  %v1471_v24 = vpop.permute.xlu1 %1470 }
 0xa28   : > { %2350 = vmatprep.subr.mxu1 %v2663_v15  ;;  %v1475_v23 = vpop.permute.xlu0 %1474 }
 0xa29   : > { %2351 = vmatpush3.msra.mxu1 %v1475_v23 }
 0xa2a   : > { %2352 = vmatprep.subr.mxu1 %v2663_v15 }
 0xa2b   : > { %2353 = vmatpush3.msra.mxu1 %v1471_v24 }
 0xa2c   : > { %2354 = vmatprep.subr.mxu1 %v2663_v15  ;;  %v1469_v25 = vpop.permute.xlu0 %1468 }
 0xa2d   : > { %2355 = vmatpush3.msra.mxu1 %v1469_v25 }
 0xa2e   : > { %2356 = vmatprep.subr.mxu1 %v2663_v15 }
 0xa2f   : > { %2357 = vmatpush3.msk.msra.mxu1 %vm1463_vm4, %v1462_v14 }
 0xa30   : > { %2358 = vmatprep.subr.mxu1 %v2663_v15 }
 0xa31   : > { %2359 = vmatpush3.msk.msra.mxu1 %vm1463_vm4, %v1461_v18 }
 0xa32   : > { %2361 = vmatmul.mubr.msk.f32.vlgmr.msra.gmra.mxu1 %vm1463_vm4, %v1452_v26  ;;  %2385 = vmatprep.subr.mxu1 %v2663_v15 }
 0xa33   : > { %2386 = vmatpush3.msk.msra.mxu1 %vm218_vm0, %v2655_v0  ;;  %2393 = vmatprep.mubr.msk.f32.mxu1 %vm2694_vm13, %v2663_v15 }
 0xa34   : > { %2387 = vmatprep.subr.mxu1 %v2663_v15 }
 0xaf2   : > { %v1555_v27 = vpop.f32.mrf.mxu1 }
 0xaf3   : > { %v1559_v28 = vmul.f32 0.1, %v1555_v27 }
 0xaf4   : > { %v2362_v29 = vpop.f32.mrf.mxu1 }
 0xaf5   : > { %v1560_v30 = vmax.f32 %v1555_v27, %v1559_v28 }
 0xaf7   : > { %1563 = vrot.lane.b32.xlu1 %v1560_v30, %s2665_s25  ;;  %s3520_s25 = smov 123  }
 0xb69   : > { %v1564_v31 = vpop.permute.xlu1 %1563 }
 0xb6a   : > { %v1566_v32 = vsel %vm320_vm5, 0.0, %v1564_v31  ;;  %vm1658_vm5 = vcmask 547840  }
 0xb6b   : > { %v1567_v33 = vsel %vm1463_vm4, %v1566_v32, 0.0 }
 0xb6c   : > { %1569 = vrot.lane.b32.xlu1 %v1567_v33, %s2662_s23  ;;  %1572 = vrot.lane.b32.xlu0 %v1567_v33, %s2661_s20 }
 0xbde   : > { %v1573_v34 = vpop.permute.xlu0 %1572  ;;  %v1570_v35 = vpop.permute.xlu1 %1569 }
 0xbdf   : > { %2366 = vmatpush3.msra.mxu0 %v1573_v34  ;;  %2388 = vmatpush3.msra.mxu1 %v1573_v34 }
 0xbe0   : > { %2367 = vmatprep.subr.mxu0 %v2663_v15  ;;  %2389 = vmatprep.subr.mxu1 %v2663_v15 }
 0xbe1   : > { %2368 = vmatpush3.msra.mxu0 %v1570_v35  ;;  %2390 = vmatpush3.msra.mxu1 %v1570_v35 }
 0xbe2   : > { %2369 = vmatprep.subr.mxu0 %v2663_v15  ;;  %2391 = vmatprep.subr.mxu1 %v2663_v15 }
 0xbe3   : > { %2370 = vmatpush3.msk.msra.mxu0 %vm1463_vm4, %v1566_v32  ;;  %2392 = vmatpush3.msk.msra.mxu1 %vm1463_vm4, %v1566_v32 }
 0xbe4   : > { %2372 = vmatmul.mubr.msk.f32.vlgmr.msra.gmra.mxu0 %vm1575_vm3, %v1561_v36  ;;  %2394 = vmatmul.mubr.msk.f32.vlgmr.msra.gmra.mxu1 %vm1575_vm3, %v1741_v37 }
 0xbe5   : > { %2374 = vmatprep.subr.mxu0 %v2663_v15  ;;  %2382 = vmatprep.mubr.msk.f32.mxu0 %vm2694_vm13, %v2663_v15 }
 0xbe6   : > { %2375 = vmatpush3.msk.msra.mxu0 %vm218_vm0, %v2655_v0  ;;  %2407 = vmatprep.subr.mxu1 %v2663_v15 }
 0xbe7   : > { %2376 = vmatprep.subr.mxu0 %v2663_v15  ;;  %2408 = vmatpush3.msk.msra.mxu1 %vm218_vm0, %v2655_v0 }
 0xbe8   : > { %2409 = vmatprep.subr.mxu1 %v2663_v15  ;;  %2423 = vmatprep.mubr.msk.f32.mxu1 %vm2694_vm13, %v2663_v15 }
 0xca4   : > { %v1645_v38 = vpop.f32.mrf.mxu0  ;;  %v1811_v39 = vpop.f32.mrf.mxu1 }
 0xca5   : > { %v1649_v40 = vadd.f32 %v1645_v38, %v1555_v27  ;;  %v1815_v41 = vadd.f32 %v1811_v39, %v1555_v27 }
 0xca6   : > { %v2373_v42 = vpop.f32.mrf.mxu0  ;;  %v2395_v43 = vpop.f32.mrf.mxu1 }
 0xca7   : > { %v1650_v44 = vmul.f32 0.1, %v1649_v40  ;;  %v1816_v45 = vmul.f32 0.1, %v1815_v41 }
 0xca9   : > { %v1651_v46 = vmax.f32 %v1649_v40, %v1650_v44  ;;  %v1817_v47 = vmax.f32 %v1815_v41, %v1816_v45 }
 0xcab   : > { %1654 = vrot.lane.b32.xlu0 %v1651_v46, %s2656_s17  ;;  %1820 = vrot.lane.b32.xlu1 %v1817_v47, %s2656_s17 }
 0xd1d   : > { %v1655_v48 = vpop.permute.xlu0 %1654  ;;  %v1821_v49 = vpop.permute.xlu1 %1820 }
 0xd1e   : > { %v1657_v50 = vsel %vm3516_vm7, 0.0, %v1655_v48  ;;  %v1823_v52 = vsel %vm3517_vm6, 0.0, %v1821_v49 }
 0xd1f   : > { %v1659_v51 = vsel %vm1658_vm5, %v1657_v50, 0.0  ;;  %v1824_v53 = vsel %vm1658_vm5, %v1823_v52, 0.0 }
 0xd20   : > { %1664 = vrot.lane.b32.xlu0 %v1659_v51, %s3518_s24  ;;  %1661 = vrot.lane.b32.xlu1 %v1659_v51, %s2660_s19 }
 0xd24   : > { %1826 = vrot.lane.b32.xlu1 %v1824_v53, %s2660_s19  ;;  %1829 = vrot.lane.b32.xlu0 %v1824_v53, %s3518_s24 }
 0xd92   : > { %v1665_v54 = vpop.permute.xlu0 %1664  ;;  %v1662_v55 = vpop.permute.xlu1 %1661 }
 0xd93   : > { %2377 = vmatpush3.msra.mxu0 %v1665_v54 }
 0xd94   : > { %2378 = vmatprep.subr.mxu0 %v2663_v15 }
 0xd95   : > { %2379 = vmatpush3.msra.mxu0 %v1662_v55 }
 0xd96   : > { %2380 = vmatprep.subr.mxu0 %v2663_v15  ;;  %v1830_v57 = vpop.permute.xlu0 %1829  ;;  %v1827_v58 = vpop.permute.xlu1 %1826 }
 0xd97   : > { %2381 = vmatpush3.msk.msra.mxu0 %vm1658_vm5, %v1657_v50 }
 0xd98   : > { %2383 = vmatmul.mubr.msk.f32.vlgmr.msra.gmra.mxu0 %vm1575_vm3, %v1652_v56  ;;  %2396 = vmatprep.subr.mxu0 %v2663_v15 }
 0xd99   : > { %2397 = vmatpush3.msk.msra.mxu0 %vm218_vm0, %v2655_v0  ;;  %2404 = vmatprep.mubr.msk.f32.mxu0 %vm2694_vm13, %v2663_v15  ;;  %vm3519_vm0 = vmmov %vm3517_vm6 }
 0xd9a   : > { %2398 = vmatprep.subr.mxu0 %v2663_v15 }
 0xd9b   : > { %2399 = vmatpush3.msra.mxu0 %v1830_v57 }
 0xd9c   : > { %2400 = vmatprep.subr.mxu0 %v2663_v15 }
 0xd9d   : > { %2401 = vmatpush3.msra.mxu0 %v1827_v58 }
 0xd9e   : > { %2402 = vmatprep.subr.mxu0 %v2663_v15 }
 0xd9f   : > { %2403 = vmatpush3.msk.msra.mxu0 %vm1658_vm5, %v1823_v52 }
 0xda0   : > { %2405 = vmatmul.mubr.msk.f32.vlgmr.msra.gmra.mxu0 %vm1575_vm3, %v1818_v59 }
 0xe58   : > { %v1736_v60 = vpop.f32.mrf.mxu0 }
 0xe59   : > { %v1740_v62 = vadd.f32 %v1736_v60, %v1649_v40 }
 0xe5a   : > { %v2384_v0 = vpop.f32.mrf.mxu0 }
 0xe60   : > { %v1901_v61 = vpop.f32.mrf.mxu0 }
 0xe61   : > { %v1905_v63 = vadd.f32 %v1901_v61, %v1815_v41 }
 0xe62   : > { %v2406_v1 = vpop.f32.mrf.mxu0 }
 0xe63   : > { %v1906_v2 = vadd.f32 %v1905_v63, %v1740_v62 }
 0xe65   : > { %v1907_v3 = vmul.f32 0.5, %v1906_v2 }
 0xe67   : > { %v1908_v4 = vmul.f32 0.1, %v1907_v3 }
 0xe69   : > { %v1909_v5 = vmax.f32 %v1907_v3, %v1908_v4 }
 0xe6b   : > { %1912 = vrot.lane.b32.xlu0 %v1909_v5, %s2656_s17  ;;  %s2162_s17 = sshll.u32 %s2732_s13, 4  ;;  %s2587_s13 = scalar_lea.vmem %s2586_s14, 32 }
 0xe6c   : > { %s3437_s3 = scalar_lea.hbm %s3476_s2, %s2162_s17 }
 0xedd   : > { %v1913_v6 = vpop.permute.xlu0 %1912 }
 0xede   : > { %v1915_v7 = vsel %vm3519_vm0, 0.0, %v1913_v6 }
 0xedf   : > { %v1916_v8 = vsel %vm1658_vm5, %v1915_v7, 0.0 }
 0xee0   : > { %1930 = vrot.lane.b32.xlu0 %v1916_v8, %s3520_s25  ;;  %1933 = vrot.lane.b32.xlu1 %v1916_v8, %s3518_s24 }
 0xee4   : > { %1924 = vrot.lane.b32.xlu0 %v1916_v8, %s2660_s19  ;;  %1927 = vrot.lane.b32.xlu1 %v1916_v8, %s3521_s26  ;;  %s172_s19 = scalar_lea.vmem [#allocation8], %s2818_s6 }
 0xee8   : > { %1918 = vrot.lane.b32.xlu0 %v1916_v8, %s2662_s23  ;;  %1921 = vrot.lane.b32.xlu1 %v1916_v8, %s2661_s20  ;;  %s2025_s20 = sshll.u32 %s172_s19, 4  ;;  %s2026_s20 = int_to_ptr.vmem [resolvable:$true] %s2025_s20 }
 0xee9   : > { %s2581_s5 = scalar_lea.vmem %s2026_s20, 16  ;;  %p2588_p10 = scmp.lt.s32.totalorder %s2026_s20, %s2586_s14 }
 0xeea   : > { %p2582_p8 = scmp.ne.s32.totalorder %s2026_s20, %s2581_s5  ;;  %p2589_p2 = scmp.lt.s32.totalorder %s2587_s13, %s2581_s5 }
 0xeec   : > { %p2583_p11 = pnand %p2582_p8, %p3523_p3  ;;  %p2590_p13 = por %p2589_p2, %p2588_p10 }
 0xeee   : > { %p2584_p7 = pneg %p2583_p11 }
 0xef0   : > { %p2591_p0 = pnand %p2590_p13, %p2584_p7 }
 0xf52   : > { %v1931_v9 = vpop.permute.xlu0 %1930  ;;  %v1934_v10 = vpop.permute.xlu1 %1933 }
 0xf53   : > { %2410 = vmatpush3.msra.mxu1 %v1934_v10 }
 0xf54   : > { %2411 = vmatprep.subr.mxu1 %v2663_v15 }
 0xf55   : > { %2412 = vmatpush3.msra.mxu1 %v1931_v9 }
 0xf56   : > { %v1925_v11 = vpop.permute.xlu0 %1924  ;;  %2413 = vmatprep.subr.mxu1 %v2663_v15  ;;  %v1928_v12 = vpop.permute.xlu1 %1927 }
 0xf57   : > { %2414 = vmatpush3.msra.mxu1 %v1928_v12 }
 0xf58   : > { %2415 = vmatprep.subr.mxu1 %v2663_v15 }
 0xf59   : > { %2416 = vmatpush3.msra.mxu1 %v1925_v11 }
 0xf5a   : > { %2417 = vmatprep.subr.mxu1 %v2663_v15  ;;  %v1922_v13 = vpop.permute.xlu1 %1921  ;;  %v1919_v14 = vpop.permute.xlu0 %1918 }
 0xf5b   : > { %2418 = vmatpush3.msra.mxu1 %v1922_v13 }
 0xf5c   : > { %2419 = vmatprep.subr.mxu1 %v2663_v15 }
 0xf5d   : > { %2420 = vmatpush3.msra.mxu1 %v1919_v14 }
 0xf5e   : > { %2421 = vmatprep.subr.mxu1 %v2663_v15 }
 0xf5f   : > { %2422 = vmatpush3.msk.msra.mxu1 %vm1658_vm5, %v1915_v7 }
 0xf60   : > { %2424 = vmatmul.mubr.msk.f32.vlgmr.msra.gmra.mxu1 %vm3522_vm1, %v1910_v16 }
0x1020   : > { %v2005_v17 = vpop.f32.mrf.mxu1 }
0x1021   : > { %2525 = vtanh.f32 %v2005_v17 }
0x1022   : > { %v2425_v18 = vpop.f32.mrf.mxu1 }
0x102e   : > { %v2526_v19 = vpop.eup %2525 }
0x102f   : > { %2011 = vst.msk [vmem:[%s172_s19] sm:$0x1] %vm2010_vm8, %v2526_v19 }
0x1030   : > { %2594 = shalt.err (!%p2591_p0)
}
0x1031   : > { %s2595_s22 = scalar_lea.hbm %s3437_s3, 16  ;;  %s2599_s27 = scalar_lea.hbm %s3476_s2, 32 }
0x1032   : > { %p2596_p5 = scmp.ne.s32.totalorder %s3437_s3, %s2595_s22  ;;  %p2600_p1 = scmp.lt.s32.totalorder %s3437_s3, %s3476_s2 }
0x1033   : > { %p2601_p4 = scmp.lt.s32.totalorder %s2599_s27, %s2595_s22 }
0x1034   : > { %p2597_p9 = pnand %p2596_p5, %p3523_p3 }
0x1035   : > { %p2602_p6 = por %p2601_p4, %p2600_p1 }
0x1036   : > { %p2598_p12 = pneg %p2597_p9 }
0x1038   : > { %p2603_p8 = pnand %p2602_p6, %p2598_p12 }
0x103a   : > { %2606 = shalt.err (!%p2603_p8)
}
0x103b   : > { %2432 = dma.vmem_to_hbm [thread:$0]  (%p3523_p3), %s2026_s20, 16, %s3437_s3, %s2013_s4  }
0x103c PF: > { %s2037_s24 = sand.u32 1, %s2637_s9   ;;  %p3524_p11 = scmp.ne.s32.totalorder %s3495_s16, 0 }
0x103d   : > { %p3525_p7 = scmp.ge.s32.totalorder %s2649_s12, 2  ;;  %s2038_s25 = scalar_lea.sflag [#allocation5], %s2037_s24 }
0x103f   : > { %p2443_p10 = pnand %p3525_p7, %p3524_p11 }
0x1041   : > { %p2444_p2 = pneg %p2443_p10 }
0x1043   : > { %2632 = dma.done.wait (%p2444_p2), %s2038_s25, 16  }
0x1044   : > { %2634 = vsyncadd (%p2444_p2), %s2038_s25, 4294967280  ;;  %p16_p13 = scmp.ge.s32.totalorder %s2765_s21, 4   ;;  %s3526_s9 = smov %s2641_s10 }
0x1045   : > { %s3527_s10 = smov %s2645_s11  ;;  %s3528_s11 = smov %s2782_s29 }
0x1046   : > { %s3529_s12 = smov %s2765_s21  ;;  %18 = sbr.rel (!%p16_p13) target bundleno = 6 (0x6), region = 77 }
0x104b   :  { %2042 = vsyncpa [#allocation4], 1 }
0x104c   :  { %2044 = vsyncpa [#allocation4 + $0x1], 1 }
0x104d   :  { %2045 = vsyncpa [#allocation7], 1 }
0x104e   :  { %2046 = vsyncpa [#allocation5], 1 }
0x104f   :  { %2048 = vsyncpa [#allocation5 + $0x1], 1 }

</bundles_post_ra>
